<compile_context>
chip_gen: v6e
topology: v6e:2x2x1
jax: 0.10.0
libtpu: 0.0.40
codegen_flags: <defaults>
</compile_context>

<pallas_src>
import math
import functools

import jax
import jax.numpy as jnp
import numpy as np
from jax.experimental import pallas as pl
from jax.experimental.pallas import tpu as pltpu


_SQRT2_INV = 1.0 / math.sqrt(2.0)


# ------------------- generation-aware VMEM budget / tiling -------------------

def _vmem_capacity_bytes():
    try:
        return int(pltpu.get_tpu_info().vmem_capacity_bytes)
    except Exception:
        return 64 * 1024 * 1024          # conservative v7x assumption

_VMEM_CAP = _vmem_capacity_bytes()
_VMEM_LIMIT = min((_VMEM_CAP * 3) // 4, 96 * 1024 * 1024)
_BIG_VMEM = _VMEM_CAP > (100 * 1024 * 1024)      # 128 MiB parts: v5e / v6e
_ROW_TARGET = 512 if _BIG_VMEM else 256           # amortize ~0.35us/step on big parts
_LANE_TARGET = 1024 if _BIG_VMEM else 512


def _tile_rows(dim, target=None):
    """Sublane (row) tile: multiple of 8 dividing dim, or the full dim."""
    if target is None:
        target = _ROW_TARGET
    if dim <= target:
        return dim
    t = target
    while t >= 8:
        if dim % t == 0:
            return t
        t //= 2
    return dim


def _tile_lanes(dim, target=None):
    """Lane (last-dim) tile: multiple of 128 dividing dim, or the full dim."""
    if target is None:
        target = _LANE_TARGET
    if dim <= target:
        return dim
    t = target
    while t >= 128:
        if dim % t == 0:
            return t
        t //= 2
    return dim


# ---------------------------- in-kernel math ----------------------------

def _erf(x):
    # Abramowitz & Stegun 7.1.26 (max abs err ~1.5e-7): matches exact erf-GELU
    # within f32 noise; exp + approx reciprocal land on the EUP slot under the
    # MXU work of the surrounding matmul.
    p = 0.3275911
    a1, a2, a3, a4, a5 = (0.254829592, -0.284496736, 1.421413741,
                          -1.453152027, 1.061405429)
    s = jnp.where(x < 0.0, -1.0, 1.0)
    ax = jnp.abs(x)
    t = pl.reciprocal(1.0 + p * ax, approx=True)     # divide on EUP slot
    poly = ((((a5 * t + a4) * t + a3) * t + a2) * t + a1) * t
    return s * (1.0 - poly * jnp.exp(-(ax * ax)))


def _gelu_exact(x):
    return 0.5 * x * (1.0 + _erf(x * _SQRT2_INV))


def _layernorm(x, g, b):
    mean = jnp.mean(x, axis=-1, keepdims=True)
    var = jnp.mean((x - mean) ** 2, axis=-1, keepdims=True)
    return (x - mean) * jax.lax.rsqrt(var + 1e-5) * g + b


# ---------------------------- Pallas kernels ----------------------------

def _linear_kernel(activation, x_ref, w_ref, b_ref, o_ref, acc_ref):
    # out[i,j] = act( sum_k x[i,k] @ w[k,j] + b[j] )   (bf16 MXU, f32 accum)
    # NOTE(perf feedback): the f32 VMEM accumulator is kept (instead of
    # accumulating into o_ref) because the output is now stored bf16 in HBM;
    # halving activation DMA outweighs the (tm, tn) scratch copy.
    @pl.when(pl.program_id(2) == 0)
    def _():
        acc_ref[...] = jnp.zeros_like(acc_ref)

    acc_ref[...] += jnp.dot(
        x_ref[...].astype(jnp.bfloat16),       # no-op when the input is bf16
        w_ref[...],                            # weights already bf16
        preferred_element_type=jnp.float32)

    @pl.when(pl.program_id(2) == pl.num_programs(2) - 1)
    def _():
        y = acc_ref[...] + b_ref[...].astype(jnp.float32)
        if activation == "gelu":               # fused GELU — no extra HBM trip
            y = _gelu_exact(y)
        o_ref[...] = y.astype(o_ref.dtype)


def _attn_kernel(n_heads, head_dim, scale, qkv_ref, o_ref):
    # One batch element per grid step.  qkv block: (S, 3D) bf16.  Heads are
    # unrolled statically; each head's context is written directly into its
    # lane slice of o_ref (no concatenate -> no big lane relayout, smaller
    # per-head live set).
    # TODO(synk): flash-style online-softmax KV tiling for long sequences and
    # a (batch, head) grid with head-major qkv layout once head_dim blocks can
    # be made 128-lane aligned; full-S scores per head are fine at this size.
    # TODO(synk): fuse the QKV projection into this kernel to drop the (T,3D)
    # HBM round trip entirely.
    d_model = n_heads * head_dim
    for h in range(n_heads):
        lo = h * head_dim
        q = (qkv_ref[:, lo:lo + head_dim].astype(jnp.float32)
             * scale).astype(jnp.bfloat16)              # fold 1/sqrt(hd) into q
        k = qkv_ref[:, d_model + lo:d_model + lo + head_dim]
        v = qkv_ref[:, 2 * d_model + lo:2 * d_model + lo + head_dim]
        s = jax.lax.dot_general(
            q, k, dimension_numbers=(((1,), (1,)), ((), ())),
            preferred_element_type=jnp.float32)         # (S, S) f32
        m = jnp.max(s, axis=-1, keepdims=True)
        p = jnp.exp(s - m)
        denom = jnp.sum(p, axis=-1, keepdims=True)
        p = p * pl.reciprocal(denom, approx=True)       # divide on EUP slot
        ctx = jnp.dot(p.astype(jnp.bfloat16), v,
                      preferred_element_type=jnp.float32)   # (S, hd)
        o_ref[:, lo:lo + head_dim] = ctx.astype(o_ref.dtype)


def _proj_add_ln_kernel(h_ref, w_ref, b_ref, res_ref, g_ref, beta_ref,
                        o_ref, acc_ref):
    # out rows = LayerNorm(res + h @ w + b).  The contraction axis (d_model or
    # d_ff) is a grid axis with an f32 VMEM accumulator so the weight streams
    # in (tk, D) slices instead of sitting fully resident (v7x 64 MiB VMEM).
    @pl.when(pl.program_id(1) == 0)
    def _():
        acc_ref[...] = jnp.zeros_like(acc_ref)

    acc_ref[...] += jnp.dot(h_ref[...].astype(jnp.bfloat16), w_ref[...],
                            preferred_element_type=jnp.float32)

    @pl.when(pl.program_id(1) == pl.num_programs(1) - 1)
    def _():
        x = (acc_ref[...] + res_ref[...].astype(jnp.float32)
             + b_ref[...].astype(jnp.float32))
        o_ref[...] = _layernorm(x, g_ref[...], beta_ref[...]).astype(o_ref.dtype)


def _ln_head_kernel(x_ref, g_ref, beta_ref, w_ref, o_ref, xn_ref):
    # logits tile = LayerNorm(x rows) @ head_w[:, j-tile]   (no bias).
    # LayerNorm + f32->bf16 cast run once per row tile (j == 0) into a VMEM
    # scratch that stays resident across all vocab tiles (stop paying the XLU
    # reductions / EUP rsqrt / cast once per vocab tile).
    @pl.when(pl.program_id(1) == 0)
    def _():
        xn = _layernorm(x_ref[...].astype(jnp.float32), g_ref[...], beta_ref[...])
        xn_ref[...] = xn.astype(jnp.bfloat16)

    o_ref[...] = jnp.dot(xn_ref[...], w_ref[...],
                         preferred_element_type=jnp.float32)


# ---------------------------- pallas_call wrappers ----------------------------

def linear(x, w, b, *, activation=None):
    """y = act(x @ w + b); output stored bf16 (feeds an MXU consumer)."""
    T, K = x.shape
    _, N = w.shape
    tm, tn, tk = _tile_rows(T), _tile_lanes(N), _tile_lanes(K)
    # TODO(synk): pl.Buffered(3) on the streamed weight spec for v5e/v6e once
    # pipeline_mode is stable in the target JAX version.
    return pl.pallas_call(
        functools.partial(_linear_kernel, activation),
        out_shape=jax.ShapeDtypeStruct((T, N), jnp.bfloat16),
        grid=(T // tm, N // tn, K // tk),
        in_specs=[
            pl.BlockSpec((tm, tk), lambda i, j, k: (i, k)),
            pl.BlockSpec((tk, tn), lambda i, j, k: (k, j)),
            pl.BlockSpec((1, tn), lambda i, j, k: (0, j)),   # bias resident over T
        ],
        out_specs=pl.BlockSpec((tm, tn), lambda i, j, k: (i, j)),
        scratch_shapes=[pltpu.VMEM((tm, tn), jnp.float32)],
        compiler_params=pltpu.CompilerParams(
            dimension_semantics=("parallel", "parallel", "arbitrary"),
            vmem_limit_bytes=_VMEM_LIMIT),
    )(x, w, b)


def attention(qkv, *, batch, seq, n_heads, head_dim):
    d_model = n_heads * head_dim
    return pl.pallas_call(
        functools.partial(_attn_kernel, n_heads, head_dim,
                          1.0 / math.sqrt(head_dim)),
        out_shape=jax.ShapeDtypeStruct((batch * seq, d_model), jnp.bfloat16),
        grid=(batch,),
        in_specs=[pl.BlockSpec((seq, 3 * d_model), lambda bi: (bi, 0))],
        out_specs=pl.BlockSpec((seq, d_model), lambda bi: (bi, 0)),
        compiler_params=pltpu.CompilerParams(
            dimension_semantics=("parallel",),
            vmem_limit_bytes=_VMEM_LIMIT),
    )(qkv)


def proj_add_ln(h, w, b, res, g, beta):
    """x_new = LayerNorm(res + h @ w + b); output f32 (residual stream)."""
    T, K = h.shape
    D = res.shape[1]
    tm, tk = _tile_rows(T), _tile_lanes(K)
    return pl.pallas_call(
        _proj_add_ln_kernel,
        out_shape=jax.ShapeDtypeStruct((T, D), jnp.float32),
        grid=(T // tm, K // tk),
        in_specs=[
            pl.BlockSpec((tm, tk), lambda i, k: (i, k)),
            pl.BlockSpec((tk, D), lambda i, k: (k, 0)),
            pl.BlockSpec((1, D), lambda i, k: (0, 0)),
            pl.BlockSpec((tm, D), lambda i, k: (i, 0)),      # residual, resident over k
            pl.BlockSpec((1, D), lambda i, k: (0, 0)),
            pl.BlockSpec((1, D), lambda i, k: (0, 0)),
        ],
        out_specs=pl.BlockSpec((tm, D), lambda i, k: (i, 0)),
        scratch_shapes=[pltpu.VMEM((tm, D), jnp.float32)],
        compiler_params=pltpu.CompilerParams(
            dimension_semantics=("parallel", "arbitrary"),
            vmem_limit_bytes=_VMEM_LIMIT),
    )(h, w, b, res, g, beta)


def ln_head(x, g, beta, w):
    T, D = x.shape
    V = w.shape[1]
    # Pad the vocab axis to a 128-multiple (GPT-2's 50257 -> 50304 style) so
    # the (D, V) head weight is always tiled, never one oversized VMEM block.
    Vp = V
    if V > 128 and V % 128 != 0:
        Vp = ((V + 127) // 128) * 128
        w = jnp.pad(w, ((0, 0), (0, Vp - V)))
    tm = _tile_rows(T)
    tn = _tile_lanes(Vp)
    out = pl.pallas_call(
        _ln_head_kernel,
        out_shape=jax.ShapeDtypeStruct((T, Vp), jnp.float32),
        grid=(T // tm, Vp // tn),
        in_specs=[
            pl.BlockSpec((tm, D), lambda i, j: (i, 0)),      # x tile resident over j
            pl.BlockSpec((1, D), lambda i, j: (0, 0)),
            pl.BlockSpec((1, D), lambda i, j: (0, 0)),
            pl.BlockSpec((D, tn), lambda i, j: (0, j)),
        ],
        out_specs=pl.BlockSpec((tm, tn), lambda i, j: (i, j)),
        scratch_shapes=[pltpu.VMEM((tm, D), jnp.bfloat16)],
        compiler_params=pltpu.CompilerParams(
            # vocab tiles must run sequentially per core so the LN'd row tile
            # cached at j == 0 is valid for every later j.
            dimension_semantics=("parallel", "arbitrary"),
            vmem_limit_bytes=_VMEM_LIMIT),
    )(x, g, beta, w)
    return out if Vp == V else out[:, :V]


# ---------------------------- parameters ----------------------------

def init_params(key, vocab, d_model, n_layers, n_heads, d_ff, context):
    del n_heads  # shapes don't depend on it
    keys = jax.random.split(key, 2 + n_layers)

    def nrm(k, shape, scale=0.02, dtype=jnp.bfloat16):
        return (scale * jax.random.normal(k, shape, dtype=jnp.float32)).astype(dtype)

    params = {
        "token_emb": nrm(keys[0], (vocab, d_model), 1.0, jnp.float32),
        "ln_f_g": jnp.ones((1, d_model), jnp.float32),
        "ln_f_b": jnp.zeros((1, d_model), jnp.float32),
        "head_w": nrm(keys[1], (d_model, vocab)),          # bf16, stored (in, out)
        "blocks": [],
    }
    for l in range(n_layers):
        bk = jax.random.split(keys[2 + l], 8)
        params["blocks"].append({
            # packed q|k|v in-proj stored as (D, 3D) = in_proj_weight.T, bf16
            "w_in": nrm(bk[0], (d_model, 3 * d_model)),
            "b_in": nrm(bk[1], (1, 3 * d_model), dtype=jnp.float32),
            "w_out": nrm(bk[2], (d_model, d_model)),
            "b_out": nrm(bk[3], (1, d_model), dtype=jnp.float32),
            "ln1_g": jnp.ones((1, d_model), jnp.float32),
            "ln1_b": jnp.zeros((1, d_model), jnp.float32),
            "w_ff1": nrm(bk[4], (d_model, d_ff)),
            "b_ff1": nrm(bk[5], (1, d_ff), dtype=jnp.float32),
            "w_ff2": nrm(bk[6], (d_ff, d_model)),
            "b_ff2": nrm(bk[7], (1, d_model), dtype=jnp.float32),
            "ln2_g": jnp.ones((1, d_model), jnp.float32),
            "ln2_b": jnp.zeros((1, d_model), jnp.float32),
        })

    # sinusoidal positional-encoding buffer (same formula as PositionalEncoding)
    pos = jnp.arange(context, dtype=jnp.float32)[:, None]
    div = jnp.exp(jnp.arange(0, d_model, 2, dtype=jnp.float32)
                  * (-math.log(10000.0) / d_model))
    pe = jnp.zeros((context, d_model), jnp.float32)
    pe = pe.at[:, 0::2].set(jnp.sin(pos * div))
    pe = pe.at[:, 1::2].set(jnp.cos(pos * div))
    params["pe"] = pe
    return params


# ---------------------------- forward pass ----------------------------

def nanogpt_forward(idx, params, *, n_heads):
    B, S = idx.shape
    D = params["token_emb"].shape[1]
    hd = D // n_heads

    # TODO(synk): embedding gather + positional-encoding add kept in JAX glue
    # (data-dependent row gather has no clean rectangular BlockSpec at this size).
    x = jnp.take(params["token_emb"], idx, axis=0) + params["pe"][:S]
    x = x.reshape(B * S, D)                                 # residual stream, f32

    for blk in params["blocks"]:
        # --- multi-head self-attention (packed bf16 qkv slab) ---
        qkv = linear(x, blk["w_in"], blk["b_in"])           # (T, 3D) bf16 [Pallas]
        ctx = attention(qkv, batch=B, seq=S,
                        n_heads=n_heads, head_dim=hd)       # (T, D) bf16  [Pallas]
        x = proj_add_ln(ctx, blk["w_out"], blk["b_out"], x,
                        blk["ln1_g"], blk["ln1_b"])         # post-norm    [Pallas]

        # --- feed forward (GELU fused into FF1, bf16 hidden slab) ---
        h = linear(x, blk["w_ff1"], blk["b_ff1"], activation="gelu")     # [Pallas]
        x = proj_add_ln(h, blk["w_ff2"], blk["b_ff2"], x,
                        blk["ln2_g"], blk["ln2_b"])                      # [Pallas]

    logits = ln_head(x, params["ln_f_g"], params["ln_f_b"], params["head_w"])
    return logits.reshape(B, S, -1)


# ---------------------------- pure-JAX reference ----------------------------

def _ln_ref(x, g, b):
    mean = jnp.mean(x, axis=-1, keepdims=True)
    var = jnp.mean((x - mean) ** 2, axis=-1, keepdims=True)
    return (x - mean) * jax.lax.rsqrt(var + 1e-5) * g + b


def reference_forward(idx, params, *, n_heads):
    f32 = lambda a: a.astype(jnp.float32)
    B, S = idx.shape
    D = params["token_emb"].shape[1]
    H, hd = n_heads, D // n_heads
    x = jnp.take(params["token_emb"], idx, axis=0) + params["pe"][:S]
    x = x.reshape(B * S, D)
    for blk in params["blocks"]:
        qkv = x @ f32(blk["w_in"]) + blk["b_in"]
        qkv = qkv.reshape(B, S, 3, H, hd)
        q = qkv[:, :, 0].transpose(0, 2, 1, 3).reshape(B * H, S, hd)
        k = qkv[:, :, 1].transpose(0, 2, 1, 3).reshape(B * H, S, hd)
        v = qkv[:, :, 2].transpose(0, 2, 1, 3).reshape(B * H, S, hd)
        s = jnp.einsum("bqe,bke->bqk", q, k) / math.sqrt(hd)
        p = jax.nn.softmax(s, axis=-1)
        ctx = jnp.einsum("bqk,bke->bqe", p, v)
        ctx = ctx.reshape(B, H, S, hd).transpose(0, 2, 1, 3).reshape(B * S, D)
        x = _ln_ref(x + ctx @ f32(blk["w_out"]) + blk["b_out"],
                    blk["ln1_g"], blk["ln1_b"])
        h = jax.nn.gelu(x @ f32(blk["w_ff1"]) + blk["b_ff1"], approximate=False)
        x = _ln_ref(x + h @ f32(blk["w_ff2"]) + blk["b_ff2"],
                    blk["ln2_g"], blk["ln2_b"])
    x = _ln_ref(x, params["ln_f_g"], params["ln_f_b"])
    return (x @ f32(params["head_w"])).reshape(B, S, -1)


# ---------------------------- main ----------------------------

if __name__ == "__main__":
    # small, module-consistent config
    vocab_size, d_model, n_layers, n_heads, d_ff, context_size = 64, 32, 2, 4, 64, 16
    B, S = 2, 8

    key = jax.random.PRNGKey(0)
    pkey, ikey = jax.random.split(key)
    params = init_params(pkey, vocab_size, d_model, n_layers, n_heads, d_ff,
                         context_size)
    idx = jax.random.randint(ikey, (B, S), 0, vocab_size, dtype=jnp.int32)

    fwd = jax.jit(functools.partial(nanogpt_forward, n_heads=n_heads))
    logits = jax.block_until_ready(fwd(idx, params))

    assert logits.shape == (B, S, vocab_size), logits.shape
    ref = reference_forward(idx, params, n_heads=n_heads)
    # bf16 MXU + bf16 storage of the large activation slabs vs. an all-f32
    # reference; LayerNorm/softmax/residual math stays f32 so the gap is small.
    np.testing.assert_allclose(np.asarray(logits), np.asarray(ref),
                               atol=2e-2, rtol=2e-2)

    print("KERNEL_OK")
</pallas_src>

<mosaic_0001>
module attributes {stable_mosaic.version = 11 : i64} {
  func.func @_attn_kernel(%arg0: i32, %arg1: memref<8x96xbf16, #tpu.memory_space<vmem>>, %arg2: memref<8x32xbf16, #tpu.memory_space<vmem>>) attributes {dimension_semantics = [#tpu.dimension_semantics<parallel>], iteration_bounds = array<i64: 2>, scalar_prefetch = 0 : i64, scratch_operands = 0 : i64, tpu.core_type = #tpu.core_type<tc>, window_params = [{transform_indices = @transform_0, window_bounds = array<i64: 8, 96>}, {transform_indices = @transform_1, window_bounds = array<i64: 8, 32>}]} {
    %c0 = arith.constant 0 : index
    %c0_0 = arith.constant 0 : index
    %0 = vector.load %arg1[%c0, %c0_0] : memref<8x96xbf16, #tpu.memory_space<vmem>>, vector<8x8xbf16>
    %1 = arith.extf %0 : vector<8x8xbf16> to vector<8x8xf32>
    %cst = arith.constant 0.353553385 : f32
    %2 = vector.broadcast %cst : f32 to vector<8x8xf32>
    %3 = arith.mulf %1, %2 : vector<8x8xf32>
    %4 = arith.truncf %3 : vector<8x8xf32> to vector<8x8xbf16>
    %c0_1 = arith.constant 0 : index
    %c32 = arith.constant 32 : index
    %5 = vector.load %arg1[%c0_1, %c32] : memref<8x96xbf16, #tpu.memory_space<vmem>>, vector<8x8xbf16>
    %c0_2 = arith.constant 0 : index
    %c64 = arith.constant 64 : index
    %6 = vector.load %arg1[%c0_2, %c64] : memref<8x96xbf16, #tpu.memory_space<vmem>>, vector<8x8xbf16>
    %cst_3 = arith.constant dense<0.000000e+00> : vector<8x8xf32>
    %7 = tpu.matmul %4, %5, %cst_3 {dimension_numbers = #tpu.dot_dimension_numbers<[1], [1], [0], [0], [0, 0, 1, 0], [], []>} : vector<8x8xbf16>, vector<8x8xbf16>, vector<8x8xf32> -> vector<8x8xf32>
    %cst_4 = arith.constant dense<0xFF800000> : vector<8xf32>
    %8 = vector.multi_reduction <maximumf>, %7, %cst_4 [1] : vector<8x8xf32> to vector<8xf32>
    %9 = vector.shape_cast %8 : vector<8xf32> to vector<8x1xf32>
    %10 = vector.broadcast %9 : vector<8x1xf32> to vector<8x8xf32>
    %11 = arith.subf %7, %10 : vector<8x8xf32>
    %12 = math.exp %11 : vector<8x8xf32>
    %cst_5 = arith.constant dense<0.000000e+00> : vector<8xf32>
    %13 = vector.multi_reduction <add>, %12, %cst_5 [1] : vector<8x8xf32> to vector<8xf32>
    %14 = vector.shape_cast %13 : vector<8xf32> to vector<8x1xf32>
    %15 = tpu.reciprocal %14 {approx = true} : vector<8x1xf32> -> vector<8x1xf32>
    %16 = vector.broadcast %15 : vector<8x1xf32> to vector<8x8xf32>
    %17 = arith.mulf %12, %16 : vector<8x8xf32>
    %18 = arith.truncf %17 : vector<8x8xf32> to vector<8x8xbf16>
    %cst_6 = arith.constant dense<0.000000e+00> : vector<8x8xf32>
    %19 = tpu.matmul %18, %6, %cst_6 {dimension_numbers = #tpu.dot_dimension_numbers<[1], [0], [0], [1], [0, 0, 1, 1], [], []>} : vector<8x8xbf16>, vector<8x8xbf16>, vector<8x8xf32> -> vector<8x8xf32>
    %20 = arith.truncf %19 : vector<8x8xf32> to vector<8x8xbf16>
    %c0_7 = arith.constant 0 : index
    %c0_8 = arith.constant 0 : index
    %21 = vector.load %arg2[%c0_7, %c0_8] : memref<8x32xbf16, #tpu.memory_space<vmem>>, vector<8x8xbf16>
    tpu.vector_store %arg2[%c0_7, %c0_8], %20 {strides = array<i32>} : memref<8x32xbf16, #tpu.memory_space<vmem>>, vector<8x8xbf16>,
    %c0_9 = arith.constant 0 : index
    %c8 = arith.constant 8 : index
    %22 = vector.load %arg1[%c0_9, %c8] : memref<8x96xbf16, #tpu.memory_space<vmem>>, vector<8x8xbf16>
    %23 = arith.extf %22 : vector<8x8xbf16> to vector<8x8xf32>
    %cst_10 = arith.constant 0.353553385 : f32
    %24 = vector.broadcast %cst_10 : f32 to vector<8x8xf32>
    %25 = arith.mulf %23, %24 : vector<8x8xf32>
    %26 = arith.truncf %25 : vector<8x8xf32> to vector<8x8xbf16>
    %c0_11 = arith.constant 0 : index
    %c40 = arith.constant 40 : index
    %27 = vector.load %arg1[%c0_11, %c40] : memref<8x96xbf16, #tpu.memory_space<vmem>>, vector<8x8xbf16>
    %c0_12 = arith.constant 0 : index
    %c72 = arith.constant 72 : index
    %28 = vector.load %arg1[%c0_12, %c72] : memref<8x96xbf16, #tpu.memory_space<vmem>>, vector<8x8xbf16>
    %cst_13 = arith.constant dense<0.000000e+00> : vector<8x8xf32>
    %29 = tpu.matmul %26, %27, %cst_13 {dimension_numbers = #tpu.dot_dimension_numbers<[1], [1], [0], [0], [0, 0, 1, 0], [], []>} : vector<8x8xbf16>, vector<8x8xbf16>, vector<8x8xf32> -> vector<8x8xf32>
    %cst_14 = arith.constant dense<0xFF800000> : vector<8xf32>
    %30 = vector.multi_reduction <maximumf>, %29, %cst_14 [1] : vector<8x8xf32> to vector<8xf32>
    %31 = vector.shape_cast %30 : vector<8xf32> to vector<8x1xf32>
    %32 = vector.broadcast %31 : vector<8x1xf32> to vector<8x8xf32>
    %33 = arith.subf %29, %32 : vector<8x8xf32>
    %34 = math.exp %33 : vector<8x8xf32>
    %cst_15 = arith.constant dense<0.000000e+00> : vector<8xf32>
    %35 = vector.multi_reduction <add>, %34, %cst_15 [1] : vector<8x8xf32> to vector<8xf32>
    %36 = vector.shape_cast %35 : vector<8xf32> to vector<8x1xf32>
    %37 = tpu.reciprocal %36 {approx = true} : vector<8x1xf32> -> vector<8x1xf32>
    %38 = vector.broadcast %37 : vector<8x1xf32> to vector<8x8xf32>
    %39 = arith.mulf %34, %38 : vector<8x8xf32>
    %40 = arith.truncf %39 : vector<8x8xf32> to vector<8x8xbf16>
    %cst_16 = arith.constant dense<0.000000e+00> : vector<8x8xf32>
    %41 = tpu.matmul %40, %28, %cst_16 {dimension_numbers = #tpu.dot_dimension_numbers<[1], [0], [0], [1], [0, 0, 1, 1], [], []>} : vector<8x8xbf16>, vector<8x8xbf16>, vector<8x8xf32> -> vector<8x8xf32>
    %42 = arith.truncf %41 : vector<8x8xf32> to vector<8x8xbf16>
    %c0_17 = arith.constant 0 : index
    %c8_18 = arith.constant 8 : index
    %43 = vector.load %arg2[%c0_17, %c8_18] : memref<8x32xbf16, #tpu.memory_space<vmem>>, vector<8x8xbf16>
    tpu.vector_store %arg2[%c0_17, %c8_18], %42 {strides = array<i32>} : memref<8x32xbf16, #tpu.memory_space<vmem>>, vector<8x8xbf16>,
    %c0_19 = arith.constant 0 : index
    %c16 = arith.constant 16 : index
    %44 = vector.load %arg1[%c0_19, %c16] : memref<8x96xbf16, #tpu.memory_space<vmem>>, vector<8x8xbf16>
    %45 = arith.extf %44 : vector<8x8xbf16> to vector<8x8xf32>
    %cst_20 = arith.constant 0.353553385 : f32
    %46 = vector.broadcast %cst_20 : f32 to vector<8x8xf32>
    %47 = arith.mulf %45, %46 : vector<8x8xf32>
    %48 = arith.truncf %47 : vector<8x8xf32> to vector<8x8xbf16>
    %c0_21 = arith.constant 0 : index
    %c48 = arith.constant 48 : index
    %49 = vector.load %arg1[%c0_21, %c48] : memref<8x96xbf16, #tpu.memory_space<vmem>>, vector<8x8xbf16>
    %c0_22 = arith.constant 0 : index
    %c80 = arith.constant 80 : index
    %50 = vector.load %arg1[%c0_22, %c80] : memref<8x96xbf16, #tpu.memory_space<vmem>>, vector<8x8xbf16>
    %cst_23 = arith.constant dense<0.000000e+00> : vector<8x8xf32>
    %51 = tpu.matmul %48, %49, %cst_23 {dimension_numbers = #tpu.dot_dimension_numbers<[1], [1], [0], [0], [0, 0, 1, 0], [], []>} : vector<8x8xbf16>, vector<8x8xbf16>, vector<8x8xf32> -> vector<8x8xf32>
    %cst_24 = arith.constant dense<0xFF800000> : vector<8xf32>
    %52 = vector.multi_reduction <maximumf>, %51, %cst_24 [1] : vector<8x8xf32> to vector<8xf32>
    %53 = vector.shape_cast %52 : vector<8xf32> to vector<8x1xf32>
    %54 = vector.broadcast %53 : vector<8x1xf32> to vector<8x8xf32>
    %55 = arith.subf %51, %54 : vector<8x8xf32>
    %56 = math.exp %55 : vector<8x8xf32>
    %cst_25 = arith.constant dense<0.000000e+00> : vector<8xf32>
    %57 = vector.multi_reduction <add>, %56, %cst_25 [1] : vector<8x8xf32> to vector<8xf32>
    %58 = vector.shape_cast %57 : vector<8xf32> to vector<8x1xf32>
    %59 = tpu.reciprocal %58 {approx = true} : vector<8x1xf32> -> vector<8x1xf32>
    %60 = vector.broadcast %59 : vector<8x1xf32> to vector<8x8xf32>
    %61 = arith.mulf %56, %60 : vector<8x8xf32>
    %62 = arith.truncf %61 : vector<8x8xf32> to vector<8x8xbf16>
    %cst_26 = arith.constant dense<0.000000e+00> : vector<8x8xf32>
    %63 = tpu.matmul %62, %50, %cst_26 {dimension_numbers = #tpu.dot_dimension_numbers<[1], [0], [0], [1], [0, 0, 1, 1], [], []>} : vector<8x8xbf16>, vector<8x8xbf16>, vector<8x8xf32> -> vector<8x8xf32>
    %64 = arith.truncf %63 : vector<8x8xf32> to vector<8x8xbf16>
    %c0_27 = arith.constant 0 : index
    %c16_28 = arith.constant 16 : index
    %65 = vector.load %arg2[%c0_27, %c16_28] : memref<8x32xbf16, #tpu.memory_space<vmem>>, vector<8x8xbf16>
    tpu.vector_store %arg2[%c0_27, %c16_28], %64 {strides = array<i32>} : memref<8x32xbf16, #tpu.memory_space<vmem>>, vector<8x8xbf16>,
    %c0_29 = arith.constant 0 : index
    %c24 = arith.constant 24 : index
    %66 = vector.load %arg1[%c0_29, %c24] : memref<8x96xbf16, #tpu.memory_space<vmem>>, vector<8x8xbf16>
    %67 = arith.extf %66 : vector<8x8xbf16> to vector<8x8xf32>
    %cst_30 = arith.constant 0.353553385 : f32
    %68 = vector.broadcast %cst_30 : f32 to vector<8x8xf32>
    %69 = arith.mulf %67, %68 : vector<8x8xf32>
    %70 = arith.truncf %69 : vector<8x8xf32> to vector<8x8xbf16>
    %c0_31 = arith.constant 0 : index
    %c56 = arith.constant 56 : index
    %71 = vector.load %arg1[%c0_31, %c56] : memref<8x96xbf16, #tpu.memory_space<vmem>>, vector<8x8xbf16>
    %c0_32 = arith.constant 0 : index
    %c88 = arith.constant 88 : index
    %72 = vector.load %arg1[%c0_32, %c88] : memref<8x96xbf16, #tpu.memory_space<vmem>>, vector<8x8xbf16>
    %cst_33 = arith.constant dense<0.000000e+00> : vector<8x8xf32>
    %73 = tpu.matmul %70, %71, %cst_33 {dimension_numbers = #tpu.dot_dimension_numbers<[1], [1], [0], [0], [0, 0, 1, 0], [], []>} : vector<8x8xbf16>, vector<8x8xbf16>, vector<8x8xf32> -> vector<8x8xf32>
    %cst_34 = arith.constant dense<0xFF800000> : vector<8xf32>
    %74 = vector.multi_reduction <maximumf>, %73, %cst_34 [1] : vector<8x8xf32> to vector<8xf32>
    %75 = vector.shape_cast %74 : vector<8xf32> to vector<8x1xf32>
    %76 = vector.broadcast %75 : vector<8x1xf32> to vector<8x8xf32>
    %77 = arith.subf %73, %76 : vector<8x8xf32>
    %78 = math.exp %77 : vector<8x8xf32>
    %cst_35 = arith.constant dense<0.000000e+00> : vector<8xf32>
    %79 = vector.multi_reduction <add>, %78, %cst_35 [1] : vector<8x8xf32> to vector<8xf32>
    %80 = vector.shape_cast %79 : vector<8xf32> to vector<8x1xf32>
    %81 = tpu.reciprocal %80 {approx = true} : vector<8x1xf32> -> vector<8x1xf32>
    %82 = vector.broadcast %81 : vector<8x1xf32> to vector<8x8xf32>
    %83 = arith.mulf %78, %82 : vector<8x8xf32>
    %84 = arith.truncf %83 : vector<8x8xf32> to vector<8x8xbf16>
    %cst_36 = arith.constant dense<0.000000e+00> : vector<8x8xf32>
    %85 = tpu.matmul %84, %72, %cst_36 {dimension_numbers = #tpu.dot_dimension_numbers<[1], [0], [0], [1], [0, 0, 1, 1], [], []>} : vector<8x8xbf16>, vector<8x8xbf16>, vector<8x8xf32> -> vector<8x8xf32>
    %86 = arith.truncf %85 : vector<8x8xf32> to vector<8x8xbf16>
    %c0_37 = arith.constant 0 : index
    %c24_38 = arith.constant 24 : index
    %87 = vector.load %arg2[%c0_37, %c24_38] : memref<8x32xbf16, #tpu.memory_space<vmem>>, vector<8x8xbf16>
    tpu.vector_store %arg2[%c0_37, %c24_38], %86 {strides = array<i32>} : memref<8x32xbf16, #tpu.memory_space<vmem>>, vector<8x8xbf16>,
    return
  }
  func.func @transform_0(%arg0: i32) -> (i32, i32) {
    %c0_i32 = arith.constant 0 : i32
    %c0_i32_0 = arith.constant 0 : i32
    return %arg0, %c0_i32 : i32, i32
  }
  func.func @transform_1(%arg0: i32) -> (i32, i32) {
    %c0_i32 = arith.constant 0 : i32
    %c0_i32_0 = arith.constant 0 : i32
    return %arg0, %c0_i32 : i32, i32
  }
}

module attributes {stable_mosaic.version = 11 : i64} {
  func.func @_linear_kernel(%arg0: i32, %arg1: i32, %arg2: i32, %arg3: memref<16x32xf32, #tpu.memory_space<vmem>>, %arg4: memref<32x64xbf16, #tpu.memory_space<vmem>>, %arg5: memref<1x64xf32, #tpu.memory_space<vmem>>, %arg6: memref<16x64xbf16, #tpu.memory_space<vmem>>, %arg7: memref<16x64xf32, #tpu.memory_space<vmem>>) attributes {dimension_semantics = [#tpu.dimension_semantics<parallel>, #tpu.dimension_semantics<parallel>, #tpu.dimension_semantics<arbitrary>], iteration_bounds = array<i64: 1, 1, 1>, scalar_prefetch = 0 : i64, scratch_operands = 1 : i64, tpu.core_type = #tpu.core_type<tc>, window_params = [{transform_indices = @transform_0, window_bounds = array<i64: 16, 32>}, {transform_indices = @transform_1, window_bounds = array<i64: 32, 64>}, {transform_indices = @transform_2, window_bounds = array<i64: 1, 64>}, {transform_indices = @transform_3, window_bounds = array<i64: 16, 64>}]} {
    %c0_i32 = arith.constant 0 : i32
    %0 = arith.cmpi eq, %arg2, %c0_i32 : i32
    %1 = arith.extui %0 : i1 to i32
    %c0_i32_0 = arith.constant 0 : i32
    %2 = arith.cmpi ne, %1, %c0_i32_0 : i32
    scf.if %2 {
      %cst_10 = arith.constant 0.000000e+00 : f32
      %13 = vector.broadcast %cst_10 : f32 to vector<16x64xf32>
      %c0_11 = arith.constant 0 : index
      %c0_12 = arith.constant 0 : index
      %14 = vector.load %arg7[%c0_11, %c0_12] : memref<16x64xf32, #tpu.memory_space<vmem>>, vector<16x64xf32>
      tpu.vector_store %arg7[%c0_11, %c0_12], %13 {strides = array<i32>} : memref<16x64xf32, #tpu.memory_space<vmem>>, vector<16x64xf32>,
    } else {
    }
    %c0 = arith.constant 0 : index
    %c0_1 = arith.constant 0 : index
    %3 = vector.load %arg7[%c0, %c0_1] : memref<16x64xf32, #tpu.memory_space<vmem>>, vector<16x64xf32>
    %c0_2 = arith.constant 0 : index
    %c0_3 = arith.constant 0 : index
    %4 = vector.load %arg3[%c0_2, %c0_3] : memref<16x32xf32, #tpu.memory_space<vmem>>, vector<16x32xf32>
    %5 = arith.truncf %4 : vector<16x32xf32> to vector<16x32xbf16>
    %c0_4 = arith.constant 0 : index
    %c0_5 = arith.constant 0 : index
    %6 = vector.load %arg4[%c0_4, %c0_5] : memref<32x64xbf16, #tpu.memory_space<vmem>>, vector<32x64xbf16>
    %cst = arith.constant dense<0.000000e+00> : vector<16x64xf32>
    %7 = tpu.matmul %5, %6, %cst {dimension_numbers = #tpu.dot_dimension_numbers<[1], [0], [0], [1], [0, 0, 1, 1], [], []>} : vector<16x32xbf16>, vector<32x64xbf16>, vector<16x64xf32> -> vector<16x64xf32>
    %8 = arith.addf %3, %7 : vector<16x64xf32>
    %c0_6 = arith.constant 0 : index
    %c0_7 = arith.constant 0 : index
    %9 = vector.load %arg7[%c0_6, %c0_7] : memref<16x64xf32, #tpu.memory_space<vmem>>, vector<16x64xf32>
    tpu.vector_store %arg7[%c0_6, %c0_7], %8 {strides = array<i32>} : memref<16x64xf32, #tpu.memory_space<vmem>>, vector<16x64xf32>,
    %c0_i32_8 = arith.constant 0 : i32
    %10 = arith.cmpi eq, %arg2, %c0_i32_8 : i32
    %11 = arith.extui %10 : i1 to i32
    %c0_i32_9 = arith.constant 0 : i32
    %12 = arith.cmpi ne, %11, %c0_i32_9 : i32
    scf.if %12 {
      %c0_10 = arith.constant 0 : index
      %c0_11 = arith.constant 0 : index
      %13 = vector.load %arg7[%c0_10, %c0_11] : memref<16x64xf32, #tpu.memory_space<vmem>>, vector<16x64xf32>
      %c0_12 = arith.constant 0 : index
      %c0_13 = arith.constant 0 : index
      %14 = vector.load %arg5[%c0_12, %c0_13] : memref<1x64xf32, #tpu.memory_space<vmem>>, vector<1x64xf32>
      %15 = vector.broadcast %14 : vector<1x64xf32> to vector<16x64xf32>
      %16 = arith.addf %13, %15 : vector<16x64xf32>
      %cst_14 = arith.constant 5.000000e-01 : f32
      %17 = vector.broadcast %cst_14 : f32 to vector<16x64xf32>
      %18 = arith.mulf %17, %16 : vector<16x64xf32>
      %cst_15 = arith.constant 0.707106769 : f32
      %19 = vector.broadcast %cst_15 : f32 to vector<16x64xf32>
      %20 = arith.mulf %16, %19 : vector<16x64xf32>
      %cst_16 = arith.constant 0.000000e+00 : f32
      %21 = vector.broadcast %cst_16 : f32 to vector<16x64xf32>
      %22 = arith.cmpf olt, %20, %21 : vector<16x64xf32>
      %cst_17 = arith.constant -1.000000e+00 : f32
      %cst_18 = arith.constant 1.000000e+00 : f32
      %23 = vector.broadcast %cst_17 : f32 to vector<16x64xf32>
      %24 = vector.broadcast %cst_18 : f32 to vector<16x64xf32>
      %25 = arith.select %22, %23, %24 : vector<16x64xi1>, vector<16x64xf32>
      %26 = math.absf %20 : vector<16x64xf32>
      %cst_19 = arith.constant 0.327591091 : f32
      %27 = vector.broadcast %cst_19 : f32 to vector<16x64xf32>
      %28 = arith.mulf %27, %26 : vector<16x64xf32>
      %cst_20 = arith.constant 1.000000e+00 : f32
      %29 = vector.broadcast %cst_20 : f32 to vector<16x64xf32>
      %30 = arith.addf %29, %28 : vector<16x64xf32>
      %31 = tpu.reciprocal %30 {approx = true} : vector<16x64xf32> -> vector<16x64xf32>
      %cst_21 = arith.constant 1.06140542 : f32
      %32 = vector.broadcast %cst_21 : f32 to vector<16x64xf32>
      %33 = arith.mulf %32, %31 : vector<16x64xf32>
      %cst_22 = arith.constant -1.45315206 : f32
      %34 = vector.broadcast %cst_22 : f32 to vector<16x64xf32>
      %35 = arith.addf %33, %34 : vector<16x64xf32>
      %36 = arith.mulf %35, %31 : vector<16x64xf32>
      %cst_23 = arith.constant 1.42141378 : f32
      %37 = vector.broadcast %cst_23 : f32 to vector<16x64xf32>
      %38 = arith.addf %36, %37 : vector<16x64xf32>
      %39 = arith.mulf %38, %31 : vector<16x64xf32>
      %cst_24 = arith.constant -0.284496725 : f32
      %40 = vector.broadcast %cst_24 : f32 to vector<16x64xf32>
      %41 = arith.addf %39, %40 : vector<16x64xf32>
      %42 = arith.mulf %41, %31 : vector<16x64xf32>
      %cst_25 = arith.constant 0.254829586 : f32
      %43 = vector.broadcast %cst_25 : f32 to vector<16x64xf32>
      %44 = arith.addf %42, %43 : vector<16x64xf32>
      %45 = arith.mulf %44, %31 : vector<16x64xf32>
      %46 = arith.mulf %26, %26 : vector<16x64xf32>
      %cst_26 = arith.constant 0.000000e+00 : f32
      %47 = vector.broadcast %cst_26 : f32 to vector<16x64xf32>
      %48 = arith.subf %47, %46 : vector<16x64xf32>
      %49 = math.exp %48 : vector<16x64xf32>
      %50 = arith.mulf %45, %49 : vector<16x64xf32>
      %cst_27 = arith.constant 1.000000e+00 : f32
      %51 = vector.broadcast %cst_27 : f32 to vector<16x64xf32>
      %52 = arith.subf %51, %50 : vector<16x64xf32>
      %53 = arith.mulf %25, %52 : vector<16x64xf32>
      %cst_28 = arith.constant 1.000000e+00 : f32
      %54 = vector.broadcast %cst_28 : f32 to vector<16x64xf32>
      %55 = arith.addf %54, %53 : vector<16x64xf32>
      %56 = arith.mulf %18, %55 : vector<16x64xf32>
      %57 = arith.truncf %56 : vector<16x64xf32> to vector<16x64xbf16>
      %c0_29 = arith.constant 0 : index
      %c0_30 = arith.constant 0 : index
      %58 = vector.load %arg6[%c0_29, %c0_30] : memref<16x64xbf16, #tpu.memory_space<vmem>>, vector<16x64xbf16>
      tpu.vector_store %arg6[%c0_29, %c0_30], %57 {strides = array<i32>} : memref<16x64xbf16, #tpu.memory_space<vmem>>, vector<16x64xbf16>,
    } else {
    }
    return
  }
  func.func @transform_0(%arg0: i32, %arg1: i32, %arg2: i32) -> (i32, i32) {
    %c0_i32 = arith.constant 0 : i32
    return %arg0, %arg2 : i32, i32
  }
  func.func @transform_1(%arg0: i32, %arg1: i32, %arg2: i32) -> (i32, i32) {
    %c0_i32 = arith.constant 0 : i32
    return %arg2, %arg1 : i32, i32
  }
  func.func @transform_2(%arg0: i32, %arg1: i32, %arg2: i32) -> (i32, i32) {
    %c0_i32 = arith.constant 0 : i32
    %c0_i32_0 = arith.constant 0 : i32
    return %c0_i32, %arg1 : i32, i32
  }
  func.func @transform_3(%arg0: i32, %arg1: i32, %arg2: i32) -> (i32, i32) {
    %c0_i32 = arith.constant 0 : i32
    return %arg0, %arg1 : i32, i32
  }
}

module attributes {stable_mosaic.version = 11 : i64} {
  func.func @_linear_kernel(%arg0: i32, %arg1: i32, %arg2: i32, %arg3: memref<16x32xf32, #tpu.memory_space<vmem>>, %arg4: memref<32x96xbf16, #tpu.memory_space<vmem>>, %arg5: memref<1x96xf32, #tpu.memory_space<vmem>>, %arg6: memref<16x96xbf16, #tpu.memory_space<vmem>>, %arg7: memref<16x96xf32, #tpu.memory_space<vmem>>) attributes {dimension_semantics = [#tpu.dimension_semantics<parallel>, #tpu.dimension_semantics<parallel>, #tpu.dimension_semantics<arbitrary>], iteration_bounds = array<i64: 1, 1, 1>, scalar_prefetch = 0 : i64, scratch_operands = 1 : i64, tpu.core_type = #tpu.core_type<tc>, window_params = [{transform_indices = @transform_0, window_bounds = array<i64: 16, 32>}, {transform_indices = @transform_1, window_bounds = array<i64: 32, 96>}, {transform_indices = @transform_2, window_bounds = array<i64: 1, 96>}, {transform_indices = @transform_3, window_bounds = array<i64: 16, 96>}]} {
    %c0_i32 = arith.constant 0 : i32
    %0 = arith.cmpi eq, %arg2, %c0_i32 : i32
    %1 = arith.extui %0 : i1 to i32
    %c0_i32_0 = arith.constant 0 : i32
    %2 = arith.cmpi ne, %1, %c0_i32_0 : i32
    scf.if %2 {
      %cst_10 = arith.constant 0.000000e+00 : f32
      %13 = vector.broadcast %cst_10 : f32 to vector<16x96xf32>
      %c0_11 = arith.constant 0 : index
      %c0_12 = arith.constant 0 : index
      %14 = vector.load %arg7[%c0_11, %c0_12] : memref<16x96xf32, #tpu.memory_space<vmem>>, vector<16x96xf32>
      tpu.vector_store %arg7[%c0_11, %c0_12], %13 {strides = array<i32>} : memref<16x96xf32, #tpu.memory_space<vmem>>, vector<16x96xf32>,
    } else {
    }
    %c0 = arith.constant 0 : index
    %c0_1 = arith.constant 0 : index
    %3 = vector.load %arg7[%c0, %c0_1] : memref<16x96xf32, #tpu.memory_space<vmem>>, vector<16x96xf32>
    %c0_2 = arith.constant 0 : index
    %c0_3 = arith.constant 0 : index
    %4 = vector.load %arg3[%c0_2, %c0_3] : memref<16x32xf32, #tpu.memory_space<vmem>>, vector<16x32xf32>
    %5 = arith.truncf %4 : vector<16x32xf32> to vector<16x32xbf16>
    %c0_4 = arith.constant 0 : index
    %c0_5 = arith.constant 0 : index
    %6 = vector.load %arg4[%c0_4, %c0_5] : memref<32x96xbf16, #tpu.memory_space<vmem>>, vector<32x96xbf16>
    %cst = arith.constant dense<0.000000e+00> : vector<16x96xf32>
    %7 = tpu.matmul %5, %6, %cst {dimension_numbers = #tpu.dot_dimension_numbers<[1], [0], [0], [1], [0, 0, 1, 1], [], []>} : vector<16x32xbf16>, vector<32x96xbf16>, vector<16x96xf32> -> vector<16x96xf32>
    %8 = arith.addf %3, %7 : vector<16x96xf32>
    %c0_6 = arith.constant 0 : index
    %c0_7 = arith.constant 0 : index
    %9 = vector.load %arg7[%c0_6, %c0_7] : memref<16x96xf32, #tpu.memory_space<vmem>>, vector<16x96xf32>
    tpu.vector_store %arg7[%c0_6, %c0_7], %8 {strides = array<i32>} : memref<16x96xf32, #tpu.memory_space<vmem>>, vector<16x96xf32>,
    %c0_i32_8 = arith.constant 0 : i32
    %10 = arith.cmpi eq, %arg2, %c0_i32_8 : i32
    %11 = arith.extui %10 : i1 to i32
    %c0_i32_9 = arith.constant 0 : i32
    %12 = arith.cmpi ne, %11, %c0_i32_9 : i32
    scf.if %12 {
      %c0_10 = arith.constant 0 : index
      %c0_11 = arith.constant 0 : index
      %13 = vector.load %arg7[%c0_10, %c0_11] : memref<16x96xf32, #tpu.memory_space<vmem>>, vector<16x96xf32>
      %c0_12 = arith.constant 0 : index
      %c0_13 = arith.constant 0 : index
      %14 = vector.load %arg5[%c0_12, %c0_13] : memref<1x96xf32, #tpu.memory_space<vmem>>, vector<1x96xf32>
      %15 = vector.broadcast %14 : vector<1x96xf32> to vector<16x96xf32>
      %16 = arith.addf %13, %15 : vector<16x96xf32>
      %17 = arith.truncf %16 : vector<16x96xf32> to vector<16x96xbf16>
      %c0_14 = arith.constant 0 : index
      %c0_15 = arith.constant 0 : index
      %18 = vector.load %arg6[%c0_14, %c0_15] : memref<16x96xbf16, #tpu.memory_space<vmem>>, vector<16x96xbf16>
      tpu.vector_store %arg6[%c0_14, %c0_15], %17 {strides = array<i32>} : memref<16x96xbf16, #tpu.memory_space<vmem>>, vector<16x96xbf16>,
    } else {
    }
    return
  }
  func.func @transform_0(%arg0: i32, %arg1: i32, %arg2: i32) -> (i32, i32) {
    %c0_i32 = arith.constant 0 : i32
    return %arg0, %arg2 : i32, i32
  }
  func.func @transform_1(%arg0: i32, %arg1: i32, %arg2: i32) -> (i32, i32) {
    %c0_i32 = arith.constant 0 : i32
    return %arg2, %arg1 : i32, i32
  }
  func.func @transform_2(%arg0: i32, %arg1: i32, %arg2: i32) -> (i32, i32) {
    %c0_i32 = arith.constant 0 : i32
    %c0_i32_0 = arith.constant 0 : i32
    return %c0_i32, %arg1 : i32, i32
  }
  func.func @transform_3(%arg0: i32, %arg1: i32, %arg2: i32) -> (i32, i32) {
    %c0_i32 = arith.constant 0 : i32
    return %arg0, %arg1 : i32, i32
  }
}

module attributes {stable_mosaic.version = 11 : i64} {
  func.func @_proj_add_ln_kernel(%arg0: i32, %arg1: i32, %arg2: memref<16x32xbf16, #tpu.memory_space<vmem>>, %arg3: memref<32x32xbf16, #tpu.memory_space<vmem>>, %arg4: memref<1x32xf32, #tpu.memory_space<vmem>>, %arg5: memref<16x32xf32, #tpu.memory_space<vmem>>, %arg6: memref<1x32xf32, #tpu.memory_space<vmem>>, %arg7: memref<1x32xf32, #tpu.memory_space<vmem>>, %arg8: memref<16x32xf32, #tpu.memory_space<vmem>>, %arg9: memref<16x32xf32, #tpu.memory_space<vmem>>) attributes {dimension_semantics = [#tpu.dimension_semantics<parallel>, #tpu.dimension_semantics<arbitrary>], iteration_bounds = array<i64: 1, 1>, scalar_prefetch = 0 : i64, scratch_operands = 1 : i64, tpu.core_type = #tpu.core_type<tc>, window_params = [{transform_indices = @transform_0, window_bounds = array<i64: 16, 32>}, {transform_indices = @transform_1, window_bounds = array<i64: 32, 32>}, {pipeline_mode = #tpu.pipeline_mode<synchronous>, transform_indices = @transform_2, window_bounds = array<i64: 1, 32>}, {transform_indices = @transform_3, window_bounds = array<i64: 16, 32>}, {pipeline_mode = #tpu.pipeline_mode<synchronous>, transform_indices = @transform_4, window_bounds = array<i64: 1, 32>}, {pipeline_mode = #tpu.pipeline_mode<synchronous>, transform_indices = @transform_5, window_bounds = array<i64: 1, 32>}, {transform_indices = @transform_6, window_bounds = array<i64: 16, 32>}]} {
    %c0_i32 = arith.constant 0 : i32
    %0 = arith.cmpi eq, %arg1, %c0_i32 : i32
    %1 = arith.extui %0 : i1 to i32
    %c0_i32_0 = arith.constant 0 : i32
    %2 = arith.cmpi ne, %1, %c0_i32_0 : i32
    scf.if %2 {
      %cst_10 = arith.constant 0.000000e+00 : f32
      %12 = vector.broadcast %cst_10 : f32 to vector<16x32xf32>
      %c0_11 = arith.constant 0 : index
      %c0_12 = arith.constant 0 : index
      %13 = vector.load %arg9[%c0_11, %c0_12] : memref<16x32xf32, #tpu.memory_space<vmem>>, vector<16x32xf32>
      tpu.vector_store %arg9[%c0_11, %c0_12], %12 {strides = array<i32>} : memref<16x32xf32, #tpu.memory_space<vmem>>, vector<16x32xf32>,
    } else {
    }
    %c0 = arith.constant 0 : index
    %c0_1 = arith.constant 0 : index
    %3 = vector.load %arg9[%c0, %c0_1] : memref<16x32xf32, #tpu.memory_space<vmem>>, vector<16x32xf32>
    %c0_2 = arith.constant 0 : index
    %c0_3 = arith.constant 0 : index
    %4 = vector.load %arg2[%c0_2, %c0_3] : memref<16x32xbf16, #tpu.memory_space<vmem>>, vector<16x32xbf16>
    %c0_4 = arith.constant 0 : index
    %c0_5 = arith.constant 0 : index
    %5 = vector.load %arg3[%c0_4, %c0_5] : memref<32x32xbf16, #tpu.memory_space<vmem>>, vector<32x32xbf16>
    %cst = arith.constant dense<0.000000e+00> : vector<16x32xf32>
    %6 = tpu.matmul %4, %5, %cst {dimension_numbers = #tpu.dot_dimension_numbers<[1], [0], [0], [1], [0, 0, 1, 1], [], []>} : vector<16x32xbf16>, vector<32x32xbf16>, vector<16x32xf32> -> vector<16x32xf32>
    %7 = arith.addf %3, %6 : vector<16x32xf32>
    %c0_6 = arith.constant 0 : index
    %c0_7 = arith.constant 0 : index
    %8 = vector.load %arg9[%c0_6, %c0_7] : memref<16x32xf32, #tpu.memory_space<vmem>>, vector<16x32xf32>
    tpu.vector_store %arg9[%c0_6, %c0_7], %7 {strides = array<i32>} : memref<16x32xf32, #tpu.memory_space<vmem>>, vector<16x32xf32>,
    %c0_i32_8 = arith.constant 0 : i32
    %9 = arith.cmpi eq, %arg1, %c0_i32_8 : i32
    %10 = arith.extui %9 : i1 to i32
    %c0_i32_9 = arith.constant 0 : i32
    %11 = arith.cmpi ne, %10, %c0_i32_9 : i32
    scf.if %11 {
      %c0_10 = arith.constant 0 : index
      %c0_11 = arith.constant 0 : index
      %12 = vector.load %arg9[%c0_10, %c0_11] : memref<16x32xf32, #tpu.memory_space<vmem>>, vector<16x32xf32>
      %c0_12 = arith.constant 0 : index
      %c0_13 = arith.constant 0 : index
      %13 = vector.load %arg5[%c0_12, %c0_13] : memref<16x32xf32, #tpu.memory_space<vmem>>, vector<16x32xf32>
      %14 = arith.addf %12, %13 : vector<16x32xf32>
      %c0_14 = arith.constant 0 : index
      %c0_15 = arith.constant 0 : index
      %15 = vector.load %arg4[%c0_14, %c0_15] : memref<1x32xf32, #tpu.memory_space<vmem>>, vector<1x32xf32>
      %16 = vector.broadcast %15 : vector<1x32xf32> to vector<16x32xf32>
      %17 = arith.addf %14, %16 : vector<16x32xf32>
      %c0_16 = arith.constant 0 : index
      %c0_17 = arith.constant 0 : index
      %18 = vector.load %arg6[%c0_16, %c0_17] : memref<1x32xf32, #tpu.memory_space<vmem>>, vector<1x32xf32>
      %c0_18 = arith.constant 0 : index
      %c0_19 = arith.constant 0 : index
      %19 = vector.load %arg7[%c0_18, %c0_19] : memref<1x32xf32, #tpu.memory_space<vmem>>, vector<1x32xf32>
      %cst_20 = arith.constant dense<0.000000e+00> : vector<16xf32>
      %20 = vector.multi_reduction <add>, %17, %cst_20 [1] : vector<16x32xf32> to vector<16xf32>
      %21 = vector.shape_cast %20 : vector<16xf32> to vector<16x1xf32>
      %cst_21 = arith.constant 3.200000e+01 : f32
      %22 = vector.broadcast %cst_21 : f32 to vector<16x1xf32>
      %23 = arith.divf %21, %22 : vector<16x1xf32>
      %24 = vector.broadcast %23 : vector<16x1xf32> to vector<16x32xf32>
      %25 = arith.subf %17, %24 : vector<16x32xf32>
      %26 = arith.mulf %25, %25 : vector<16x32xf32>
      %cst_22 = arith.constant dense<0.000000e+00> : vector<16xf32>
      %27 = vector.multi_reduction <add>, %26, %cst_22 [1] : vector<16x32xf32> to vector<16xf32>
      %28 = vector.shape_cast %27 : vector<16xf32> to vector<16x1xf32>
      %cst_23 = arith.constant 3.200000e+01 : f32
      %29 = vector.broadcast %cst_23 : f32 to vector<16x1xf32>
      %30 = arith.divf %28, %29 : vector<16x1xf32>
      %31 = vector.broadcast %23 : vector<16x1xf32> to vector<16x32xf32>
      %32 = arith.subf %17, %31 : vector<16x32xf32>
      %cst_24 = arith.constant 9.99999974E-6 : f32
      %33 = vector.broadcast %cst_24 : f32 to vector<16x1xf32>
      %34 = arith.addf %30, %33 : vector<16x1xf32>
      %35 = math.rsqrt %34 : vector<16x1xf32>
      %36 = vector.broadcast %35 : vector<16x1xf32> to vector<16x32xf32>
      %37 = arith.mulf %32, %36 : vector<16x32xf32>
      %38 = vector.broadcast %18 : vector<1x32xf32> to vector<16x32xf32>
      %39 = arith.mulf %37, %38 : vector<16x32xf32>
      %40 = vector.broadcast %19 : vector<1x32xf32> to vector<16x32xf32>
      %41 = arith.addf %39, %40 : vector<16x32xf32>
      %c0_25 = arith.constant 0 : index
      %c0_26 = arith.constant 0 : index
      %42 = vector.load %arg8[%c0_25, %c0_26] : memref<16x32xf32, #tpu.memory_space<vmem>>, vector<16x32xf32>
      tpu.vector_store %arg8[%c0_25, %c0_26], %41 {strides = array<i32>} : memref<16x32xf32, #tpu.memory_space<vmem>>, vector<16x32xf32>,
    } else {
    }
    return
  }
  func.func @transform_0(%arg0: i32, %arg1: i32) -> (i32, i32) {
    %c0_i32 = arith.constant 0 : i32
    return %arg0, %arg1 : i32, i32
  }
  func.func @transform_1(%arg0: i32, %arg1: i32) -> (i32, i32) {
    %c0_i32 = arith.constant 0 : i32
    %c0_i32_0 = arith.constant 0 : i32
    return %arg1, %c0_i32 : i32, i32
  }
  func.func @transform_2(%arg0: i32, %arg1: i32) -> (i32, i32) {
    %c0_i32 = arith.constant 0 : i32
    %c0_i32_0 = arith.constant 0 : i32
    %c0_i32_1 = arith.constant 0 : i32
    return %c0_i32, %c0_i32_0 : i32, i32
  }
  func.func @transform_3(%arg0: i32, %arg1: i32) -> (i32, i32) {
    %c0_i32 = arith.constant 0 : i32
    %c0_i32_0 = arith.constant 0 : i32
    return %arg0, %c0_i32 : i32, i32
  }
  func.func @transform_4(%arg0: i32, %arg1: i32) -> (i32, i32) {
    %c0_i32 = arith.constant 0 : i32
    %c0_i32_0 = arith.constant 0 : i32
    %c0_i32_1 = arith.constant 0 : i32
    return %c0_i32, %c0_i32_0 : i32, i32
  }
  func.func @transform_5(%arg0: i32, %arg1: i32) -> (i32, i32) {
    %c0_i32 = arith.constant 0 : i32
    %c0_i32_0 = arith.constant 0 : i32
    %c0_i32_1 = arith.constant 0 : i32
    return %c0_i32, %c0_i32_0 : i32, i32
  }
  func.func @transform_6(%arg0: i32, %arg1: i32) -> (i32, i32) {
    %c0_i32 = arith.constant 0 : i32
    %c0_i32_0 = arith.constant 0 : i32
    return %arg0, %c0_i32 : i32, i32
  }
}

module attributes {stable_mosaic.version = 11 : i64} {
  func.func @_ln_head_kernel(%arg0: i32, %arg1: i32, %arg2: memref<16x32xf32, #tpu.memory_space<vmem>>, %arg3: memref<1x32xf32, #tpu.memory_space<vmem>>, %arg4: memref<1x32xf32, #tpu.memory_space<vmem>>, %arg5: memref<32x64xbf16, #tpu.memory_space<vmem>>, %arg6: memref<16x64xf32, #tpu.memory_space<vmem>>, %arg7: memref<16x32xbf16, #tpu.memory_space<vmem>>) attributes {dimension_semantics = [#tpu.dimension_semantics<parallel>, #tpu.dimension_semantics<arbitrary>], iteration_bounds = array<i64: 1, 1>, scalar_prefetch = 0 : i64, scratch_operands = 1 : i64, tpu.core_type = #tpu.core_type<tc>, window_params = [{transform_indices = @transform_0, window_bounds = array<i64: 16, 32>}, {pipeline_mode = #tpu.pipeline_mode<synchronous>, transform_indices = @transform_1, window_bounds = array<i64: 1, 32>}, {pipeline_mode = #tpu.pipeline_mode<synchronous>, transform_indices = @transform_2, window_bounds = array<i64: 1, 32>}, {transform_indices = @transform_3, window_bounds = array<i64: 32, 64>}, {transform_indices = @transform_4, window_bounds = array<i64: 16, 64>}]} {
    %c0_i32 = arith.constant 0 : i32
    %0 = arith.cmpi eq, %arg1, %c0_i32 : i32
    %1 = arith.extui %0 : i1 to i32
    %c0_i32_0 = arith.constant 0 : i32
    %2 = arith.cmpi ne, %1, %c0_i32_0 : i32
    scf.if %2 {
      %c0_6 = arith.constant 0 : index
      %c0_7 = arith.constant 0 : index
      %7 = vector.load %arg2[%c0_6, %c0_7] : memref<16x32xf32, #tpu.memory_space<vmem>>, vector<16x32xf32>
      %c0_8 = arith.constant 0 : index
      %c0_9 = arith.constant 0 : index
      %8 = vector.load %arg3[%c0_8, %c0_9] : memref<1x32xf32, #tpu.memory_space<vmem>>, vector<1x32xf32>
      %c0_10 = arith.constant 0 : index
      %c0_11 = arith.constant 0 : index
      %9 = vector.load %arg4[%c0_10, %c0_11] : memref<1x32xf32, #tpu.memory_space<vmem>>, vector<1x32xf32>
      %cst_12 = arith.constant dense<0.000000e+00> : vector<16xf32>
      %10 = vector.multi_reduction <add>, %7, %cst_12 [1] : vector<16x32xf32> to vector<16xf32>
      %11 = vector.shape_cast %10 : vector<16xf32> to vector<16x1xf32>
      %cst_13 = arith.constant 3.200000e+01 : f32
      %12 = vector.broadcast %cst_13 : f32 to vector<16x1xf32>
      %13 = arith.divf %11, %12 : vector<16x1xf32>
      %14 = vector.broadcast %13 : vector<16x1xf32> to vector<16x32xf32>
      %15 = arith.subf %7, %14 : vector<16x32xf32>
      %16 = arith.mulf %15, %15 : vector<16x32xf32>
      %cst_14 = arith.constant dense<0.000000e+00> : vector<16xf32>
      %17 = vector.multi_reduction <add>, %16, %cst_14 [1] : vector<16x32xf32> to vector<16xf32>
      %18 = vector.shape_cast %17 : vector<16xf32> to vector<16x1xf32>
      %cst_15 = arith.constant 3.200000e+01 : f32
      %19 = vector.broadcast %cst_15 : f32 to vector<16x1xf32>
      %20 = arith.divf %18, %19 : vector<16x1xf32>
      %21 = vector.broadcast %13 : vector<16x1xf32> to vector<16x32xf32>
      %22 = arith.subf %7, %21 : vector<16x32xf32>
      %cst_16 = arith.constant 9.99999974E-6 : f32
      %23 = vector.broadcast %cst_16 : f32 to vector<16x1xf32>
      %24 = arith.addf %20, %23 : vector<16x1xf32>
      %25 = math.rsqrt %24 : vector<16x1xf32>
      %26 = vector.broadcast %25 : vector<16x1xf32> to vector<16x32xf32>
      %27 = arith.mulf %22, %26 : vector<16x32xf32>
      %28 = vector.broadcast %8 : vector<1x32xf32> to vector<16x32xf32>
      %29 = arith.mulf %27, %28 : vector<16x32xf32>
      %30 = vector.broadcast %9 : vector<1x32xf32> to vector<16x32xf32>
      %31 = arith.addf %29, %30 : vector<16x32xf32>
      %32 = arith.truncf %31 : vector<16x32xf32> to vector<16x32xbf16>
      %c0_17 = arith.constant 0 : index
      %c0_18 = arith.constant 0 : index
      %33 = vector.load %arg7[%c0_17, %c0_18] : memref<16x32xbf16, #tpu.memory_space<vmem>>, vector<16x32xbf16>
      tpu.vector_store %arg7[%c0_17, %c0_18], %32 {strides = array<i32>} : memref<16x32xbf16, #tpu.memory_space<vmem>>, vector<16x32xbf16>,
    } else {
    }
    %c0 = arith.constant 0 : index
    %c0_1 = arith.constant 0 : index
    %3 = vector.load %arg7[%c0, %c0_1] : memref<16x32xbf16, #tpu.memory_space<vmem>>, vector<16x32xbf16>
    %c0_2 = arith.constant 0 : index
    %c0_3 = arith.constant 0 : index
    %4 = vector.load %arg5[%c0_2, %c0_3] : memref<32x64xbf16, #tpu.memory_space<vmem>>, vector<32x64xbf16>
    %cst = arith.constant dense<0.000000e+00> : vector<16x64xf32>
    %5 = tpu.matmul %3, %4, %cst {dimension_numbers = #tpu.dot_dimension_numbers<[1], [0], [0], [1], [0, 0, 1, 1], [], []>} : vector<16x32xbf16>, vector<32x64xbf16>, vector<16x64xf32> -> vector<16x64xf32>
    %c0_4 = arith.constant 0 : index
    %c0_5 = arith.constant 0 : index
    %6 = vector.load %arg6[%c0_4, %c0_5] : memref<16x64xf32, #tpu.memory_space<vmem>>, vector<16x64xf32>
    tpu.vector_store %arg6[%c0_4, %c0_5], %5 {strides = array<i32>} : memref<16x64xf32, #tpu.memory_space<vmem>>, vector<16x64xf32>,
    return
  }
  func.func @transform_0(%arg0: i32, %arg1: i32) -> (i32, i32) {
    %c0_i32 = arith.constant 0 : i32
    %c0_i32_0 = arith.constant 0 : i32
    return %arg0, %c0_i32 : i32, i32
  }
  func.func @transform_1(%arg0: i32, %arg1: i32) -> (i32, i32) {
    %c0_i32 = arith.constant 0 : i32
    %c0_i32_0 = arith.constant 0 : i32
    %c0_i32_1 = arith.constant 0 : i32
    return %c0_i32, %c0_i32_0 : i32, i32
  }
  func.func @transform_2(%arg0: i32, %arg1: i32) -> (i32, i32) {
    %c0_i32 = arith.constant 0 : i32
    %c0_i32_0 = arith.constant 0 : i32
    %c0_i32_1 = arith.constant 0 : i32
    return %c0_i32, %c0_i32_0 : i32, i32
  }
  func.func @transform_3(%arg0: i32, %arg1: i32) -> (i32, i32) {
    %c0_i32 = arith.constant 0 : i32
    %c0_i32_0 = arith.constant 0 : i32
    return %c0_i32, %arg1 : i32, i32
  }
  func.func @transform_4(%arg0: i32, %arg1: i32) -> (i32, i32) {
    %c0_i32 = arith.constant 0 : i32
    return %arg0, %arg1 : i32, i32
  }
}

module attributes {stable_mosaic.version = 11 : i64} {
  func.func @_proj_add_ln_kernel(%arg0: i32, %arg1: i32, %arg2: memref<16x64xbf16, #tpu.memory_space<vmem>>, %arg3: memref<64x32xbf16, #tpu.memory_space<vmem>>, %arg4: memref<1x32xf32, #tpu.memory_space<vmem>>, %arg5: memref<16x32xf32, #tpu.memory_space<vmem>>, %arg6: memref<1x32xf32, #tpu.memory_space<vmem>>, %arg7: memref<1x32xf32, #tpu.memory_space<vmem>>, %arg8: memref<16x32xf32, #tpu.memory_space<vmem>>, %arg9: memref<16x32xf32, #tpu.memory_space<vmem>>) attributes {dimension_semantics = [#tpu.dimension_semantics<parallel>, #tpu.dimension_semantics<arbitrary>], iteration_bounds = array<i64: 1, 1>, scalar_prefetch = 0 : i64, scratch_operands = 1 : i64, tpu.core_type = #tpu.core_type<tc>, window_params = [{transform_indices = @transform_0, window_bounds = array<i64: 16, 64>}, {transform_indices = @transform_1, window_bounds = array<i64: 64, 32>}, {pipeline_mode = #tpu.pipeline_mode<synchronous>, transform_indices = @transform_2, window_bounds = array<i64: 1, 32>}, {transform_indices = @transform_3, window_bounds = array<i64: 16, 32>}, {pipeline_mode = #tpu.pipeline_mode<synchronous>, transform_indices = @transform_4, window_bounds = array<i64: 1, 32>}, {pipeline_mode = #tpu.pipeline_mode<synchronous>, transform_indices = @transform_5, window_bounds = array<i64: 1, 32>}, {transform_indices = @transform_6, window_bounds = array<i64: 16, 32>}]} {
    %c0_i32 = arith.constant 0 : i32
    %0 = arith.cmpi eq, %arg1, %c0_i32 : i32
    %1 = arith.extui %0 : i1 to i32
    %c0_i32_0 = arith.constant 0 : i32
    %2 = arith.cmpi ne, %1, %c0_i32_0 : i32
    scf.if %2 {
      %cst_10 = arith.constant 0.000000e+00 : f32
      %12 = vector.broadcast %cst_10 : f32 to vector<16x32xf32>
      %c0_11 = arith.constant 0 : index
      %c0_12 = arith.constant 0 : index
      %13 = vector.load %arg9[%c0_11, %c0_12] : memref<16x32xf32, #tpu.memory_space<vmem>>, vector<16x32xf32>
      tpu.vector_store %arg9[%c0_11, %c0_12], %12 {strides = array<i32>} : memref<16x32xf32, #tpu.memory_space<vmem>>, vector<16x32xf32>,
    } else {
    }
    %c0 = arith.constant 0 : index
    %c0_1 = arith.constant 0 : index
    %3 = vector.load %arg9[%c0, %c0_1] : memref<16x32xf32, #tpu.memory_space<vmem>>, vector<16x32xf32>
    %c0_2 = arith.constant 0 : index
    %c0_3 = arith.constant 0 : index
    %4 = vector.load %arg2[%c0_2, %c0_3] : memref<16x64xbf16, #tpu.memory_space<vmem>>, vector<16x64xbf16>
    %c0_4 = arith.constant 0 : index
    %c0_5 = arith.constant 0 : index
    %5 = vector.load %arg3[%c0_4, %c0_5] : memref<64x32xbf16, #tpu.memory_space<vmem>>, vector<64x32xbf16>
    %cst = arith.constant dense<0.000000e+00> : vector<16x32xf32>
    %6 = tpu.matmul %4, %5, %cst {dimension_numbers = #tpu.dot_dimension_numbers<[1], [0], [0], [1], [0, 0, 1, 1], [], []>} : vector<16x64xbf16>, vector<64x32xbf16>, vector<16x32xf32> -> vector<16x32xf32>
    %7 = arith.addf %3, %6 : vector<16x32xf32>
    %c0_6 = arith.constant 0 : index
    %c0_7 = arith.constant 0 : index
    %8 = vector.load %arg9[%c0_6, %c0_7] : memref<16x32xf32, #tpu.memory_space<vmem>>, vector<16x32xf32>
    tpu.vector_store %arg9[%c0_6, %c0_7], %7 {strides = array<i32>} : memref<16x32xf32, #tpu.memory_space<vmem>>, vector<16x32xf32>,
    %c0_i32_8 = arith.constant 0 : i32
    %9 = arith.cmpi eq, %arg1, %c0_i32_8 : i32
    %10 = arith.extui %9 : i1 to i32
    %c0_i32_9 = arith.constant 0 : i32
    %11 = arith.cmpi ne, %10, %c0_i32_9 : i32
    scf.if %11 {
      %c0_10 = arith.constant 0 : index
      %c0_11 = arith.constant 0 : index
      %12 = vector.load %arg9[%c0_10, %c0_11] : memref<16x32xf32, #tpu.memory_space<vmem>>, vector<16x32xf32>
      %c0_12 = arith.constant 0 : index
      %c0_13 = arith.constant 0 : index
      %13 = vector.load %arg5[%c0_12, %c0_13] : memref<16x32xf32, #tpu.memory_space<vmem>>, vector<16x32xf32>
      %14 = arith.addf %12, %13 : vector<16x32xf32>
      %c0_14 = arith.constant 0 : index
      %c0_15 = arith.constant 0 : index
      %15 = vector.load %arg4[%c0_14, %c0_15] : memref<1x32xf32, #tpu.memory_space<vmem>>, vector<1x32xf32>
      %16 = vector.broadcast %15 : vector<1x32xf32> to vector<16x32xf32>
      %17 = arith.addf %14, %16 : vector<16x32xf32>
      %c0_16 = arith.constant 0 : index
      %c0_17 = arith.constant 0 : index
      %18 = vector.load %arg6[%c0_16, %c0_17] : memref<1x32xf32, #tpu.memory_space<vmem>>, vector<1x32xf32>
      %c0_18 = arith.constant 0 : index
      %c0_19 = arith.constant 0 : index
      %19 = vector.load %arg7[%c0_18, %c0_19] : memref<1x32xf32, #tpu.memory_space<vmem>>, vector<1x32xf32>
      %cst_20 = arith.constant dense<0.000000e+00> : vector<16xf32>
      %20 = vector.multi_reduction <add>, %17, %cst_20 [1] : vector<16x32xf32> to vector<16xf32>
      %21 = vector.shape_cast %20 : vector<16xf32> to vector<16x1xf32>
      %cst_21 = arith.constant 3.200000e+01 : f32
      %22 = vector.broadcast %cst_21 : f32 to vector<16x1xf32>
      %23 = arith.divf %21, %22 : vector<16x1xf32>
      %24 = vector.broadcast %23 : vector<16x1xf32> to vector<16x32xf32>
      %25 = arith.subf %17, %24 : vector<16x32xf32>
      %26 = arith.mulf %25, %25 : vector<16x32xf32>
      %cst_22 = arith.constant dense<0.000000e+00> : vector<16xf32>
      %27 = vector.multi_reduction <add>, %26, %cst_22 [1] : vector<16x32xf32> to vector<16xf32>
      %28 = vector.shape_cast %27 : vector<16xf32> to vector<16x1xf32>
      %cst_23 = arith.constant 3.200000e+01 : f32
      %29 = vector.broadcast %cst_23 : f32 to vector<16x1xf32>
      %30 = arith.divf %28, %29 : vector<16x1xf32>
      %31 = vector.broadcast %23 : vector<16x1xf32> to vector<16x32xf32>
      %32 = arith.subf %17, %31 : vector<16x32xf32>
      %cst_24 = arith.constant 9.99999974E-6 : f32
      %33 = vector.broadcast %cst_24 : f32 to vector<16x1xf32>
      %34 = arith.addf %30, %33 : vector<16x1xf32>
      %35 = math.rsqrt %34 : vector<16x1xf32>
      %36 = vector.broadcast %35 : vector<16x1xf32> to vector<16x32xf32>
      %37 = arith.mulf %32, %36 : vector<16x32xf32>
      %38 = vector.broadcast %18 : vector<1x32xf32> to vector<16x32xf32>
      %39 = arith.mulf %37, %38 : vector<16x32xf32>
      %40 = vector.broadcast %19 : vector<1x32xf32> to vector<16x32xf32>
      %41 = arith.addf %39, %40 : vector<16x32xf32>
      %c0_25 = arith.constant 0 : index
      %c0_26 = arith.constant 0 : index
      %42 = vector.load %arg8[%c0_25, %c0_26] : memref<16x32xf32, #tpu.memory_space<vmem>>, vector<16x32xf32>
      tpu.vector_store %arg8[%c0_25, %c0_26], %41 {strides = array<i32>} : memref<16x32xf32, #tpu.memory_space<vmem>>, vector<16x32xf32>,
    } else {
    }
    return
  }
  func.func @transform_0(%arg0: i32, %arg1: i32) -> (i32, i32) {
    %c0_i32 = arith.constant 0 : i32
    return %arg0, %arg1 : i32, i32
  }
  func.func @transform_1(%arg0: i32, %arg1: i32) -> (i32, i32) {
    %c0_i32 = arith.constant 0 : i32
    %c0_i32_0 = arith.constant 0 : i32
    return %arg1, %c0_i32 : i32, i32
  }
  func.func @transform_2(%arg0: i32, %arg1: i32) -> (i32, i32) {
    %c0_i32 = arith.constant 0 : i32
    %c0_i32_0 = arith.constant 0 : i32
    %c0_i32_1 = arith.constant 0 : i32
    return %c0_i32, %c0_i32_0 : i32, i32
  }
  func.func @transform_3(%arg0: i32, %arg1: i32) -> (i32, i32) {
    %c0_i32 = arith.constant 0 : i32
    %c0_i32_0 = arith.constant 0 : i32
    return %arg0, %c0_i32 : i32, i32
  }
  func.func @transform_4(%arg0: i32, %arg1: i32) -> (i32, i32) {
    %c0_i32 = arith.constant 0 : i32
    %c0_i32_0 = arith.constant 0 : i32
    %c0_i32_1 = arith.constant 0 : i32
    return %c0_i32, %c0_i32_0 : i32, i32
  }
  func.func @transform_5(%arg0: i32, %arg1: i32) -> (i32, i32) {
    %c0_i32 = arith.constant 0 : i32
    %c0_i32_0 = arith.constant 0 : i32
    %c0_i32_1 = arith.constant 0 : i32
    return %c0_i32, %c0_i32_0 : i32, i32
  }
  func.func @transform_6(%arg0: i32, %arg1: i32) -> (i32, i32) {
    %c0_i32 = arith.constant 0 : i32
    %c0_i32_0 = arith.constant 0 : i32
    return %arg0, %c0_i32 : i32, i32
  }
}

</mosaic_0001>

<bundles_post_ra>
// kernel: nanogpt_forward.14
= control target key start
LH: loop header
LB: loop body
LE: loop exit
PB: predicated region body
PF: predicated region fallthrough
CT: control target
= control target key end

     0   :  { %vm19_vm0 = vcmask 523264   ;;  %v206_v0 = vmov 0.0   ;;  %vm207_vm1 = vmmov 0   ;;  %vm43_vm2 = vcmask 261120   ;;  %s254_s1 = inlined_call_operand.vmem [shape: bf16[32,64], index: 1, kind: input, shape index: {}]   ;;  %s255_s0 = inlined_call_operand.vmem [shape: f32[16,32], index: 0, kind: input, shape index: {}]   ;;  %s256_s2 = inlined_call_operand.vmem [shape: f32[1,64], index: 2, kind: input, shape index: {}]   ;;  %s257_s3 = inlined_call_operand.vmem [shape: bf16[16,64], index: 3, kind: output, shape index: {}]  }
   0x1   :  { %185 = vmatprep.subr.bf16.mxu0 %v206_v0  ;;  %v196_v1 = vld [vmem:[%s254_s1 + $0x8] sm:$0xff]   ;;  %189 = vmatprep.mubr.msk.bf16.mxu0 %vm207_vm1, %v206_v0  ;;  %20 = vst.msk [vmem:[#allocation2] sm:$0xff] %vm19_vm0, %v206_v0  ;;  %21 = vst.msk [vmem:[#allocation2 + $0x8] sm:$0xff] %vm19_vm0, %v206_v0  ;;  %v197_v2 = vld [vmem:[%s254_s1] sm:$0xff]   ;;  %v208_v57 = vmov 1.0   ;;  %vm167_vm5 = vcmask 519168  }
   0x2   :  { %186 = vmatpush3.bf16.msra.mxu0 %v196_v1  ;;  %v24_v3 = vld [vmem:[%s255_s0] sm:$0xff]  ;;  %v25_v4 = vld [vmem:[%s255_s0 + $0x8] sm:$0xff] }
   0x3   :  { %187 = vmatprep.subr.bf16.mxu0 %v206_v0  ;;  %v26_v5 = vpack.c.bf16 %v25_v4, %v24_v3  ;;  %v177_v14 = vld [vmem:[%s256_s2] ss:$0 sm:$0xff] }
   0x6   :  { %188 = vmatpush3.bf16.msra.mxu0 %v197_v2 }
   0x8   :  { %v22_v6 = vld [vmem:[#allocation2] sm:$0xff]  ;;  %v23_v10 = vld [vmem:[#allocation2 + $0x8] sm:$0xff] }
   0x9   :  { %190 = vmatmul.mubr.msk.bf16.vlgmr.msra.gmra.mxu0 %vm43_vm2, %v26_v5 }
  0xc9   :  { %v81_v7 = vpop.f32.mrf.mxu0 }
  0xca   :  { %v88_v8 = vadd.f32 %v81_v7, %v22_v6 }
  0xcb   :  { %v191_v9 = vpop.f32.mrf.mxu0 }
  0xcc   :  { %91 = vst.msk [vmem:[#allocation2] sm:$0xff] %vm19_vm0, %v88_v8 }
  0xcd   :  { %v84_v11 = vpop.f32.mrf.mxu0 }
  0xce   :  { %v89_v12 = vadd.f32 %v84_v11, %v23_v10 }
  0xcf   :  { %v192_v13 = vpop.f32.mrf.mxu0 }
  0xd0   :  { %92 = vst.msk [vmem:[#allocation2 + $0x8] sm:$0xff] %vm19_vm0, %v89_v12 }
  0xd3   :  { %v96_v15 = vld [vmem:[#allocation2] sm:$0xff] }
  0xd4   :  { %v105_v16 = vadd.f32 %v177_v14, %v96_v15 }
  0xd6   :  { %v109_v17 = vmul.f32 0.70710677, %v105_v16  ;;  %v107_v61 = vmul.f32 0.5, %v105_v16 }
  0xd7   :  { %v97_v18 = vld [vmem:[#allocation2 + $0x8] sm:$0xff] }
  0xd8   :  { %v115_v19 = vand.u32 2147483647, %v109_v17  ;;  %v106_v20 = vadd.f32 %v177_v14, %v97_v18  ;;  %vm111_vm3 = vcmp.lt.f32.partialorder %v109_v17, 0.0 }
  0xd9   :  { %v113_v58 = vsel %vm111_vm3, -1.0, %v208_v57 }
  0xda   :  { %v117_v21 = vmul.f32 0.3275911, %v115_v19  ;;  %v110_v22 = vmul.f32 0.70710677, %v106_v20  ;;  %v141_v27 = vmul.f32 %v115_v19, %v115_v19  ;;  %v108_v4 = vmul.f32 0.5, %v106_v20 }
  0xdc   :  { %v119_v23 = vadd.f32 1.0, %v117_v21  ;;  %v116_v24 = vand.u32 2147483647, %v110_v22  ;;  %v143_v28 = vsub.f32 0.0, %v141_v27  ;;  %vm112_vm4 = vcmp.lt.f32.partialorder %v110_v22, 0.0 }
  0xdd   :  { %v114_v0 = vsel %vm112_vm4, -1.0, %v208_v57 }
  0xde   :  { %198 = vrcp.f32 %v119_v23  ;;  %v118_v25 = vmul.f32 0.3275911, %v116_v24  ;;  %v142_v29 = vmul.f32 %v116_v24, %v116_v24  ;;  %v145_v32 = vmul.f32 1.442695, %v143_v28 }
  0xe0   :  { %v120_v26 = vadd.f32 1.0, %v118_v25  ;;  %v144_v33 = vsub.f32 0.0, %v142_v29 }
  0xe2   :  { %200 = vrcp.f32 %v120_v26  ;;  %v147_v38 = vmul.f32 1.442695, %v144_v33 }
  0xe3   :  { %202 = vpow2.f32 %v145_v32 }
  0xe4   :  { %204 = vpow2.f32 %v147_v38 }
  0xeb   :  { %v199_v30 = vpop.eup %198 }
  0xec   :  { %v123_v31 = vmul.f32 1.0614054, %v199_v30 }
  0xee   :  { %v125_v34 = vadd.f32 -1.4531521, %v123_v31 }
  0xef   :  { %v201_v35 = vpop.eup %200 }
  0xf0   :  { %v127_v36 = vmul.f32 %v199_v30, %v125_v34  ;;  %v124_v37 = vmul.f32 1.0614054, %v201_v35  ;;  %v203_v51 = vpop.eup %202 }
  0xf1   :  { %v205_v56 = vpop.eup %204 }
  0xf2   :  { %v129_v39 = vadd.f32 1.4214138, %v127_v36  ;;  %v126_v40 = vadd.f32 -1.4531521, %v124_v37 }
  0xf4   :  { %v131_v41 = vmul.f32 %v199_v30, %v129_v39  ;;  %v128_v42 = vmul.f32 %v201_v35, %v126_v40 }
  0xf6   :  { %v133_v43 = vadd.f32 -0.28449672, %v131_v41  ;;  %v130_v44 = vadd.f32 1.4214138, %v128_v42 }
  0xf8   :  { %v135_v45 = vmul.f32 %v199_v30, %v133_v43  ;;  %v132_v46 = vmul.f32 %v201_v35, %v130_v44 }
  0xfa   :  { %v137_v47 = vadd.f32 0.2548296, %v135_v45  ;;  %v134_v48 = vadd.f32 -0.28449672, %v132_v46 }
  0xfc   :  { %v139_v49 = vmul.f32 %v199_v30, %v137_v47  ;;  %v136_v50 = vmul.f32 %v201_v35, %v134_v48 }
  0xfe   :  { %v149_v52 = vmul.f32 %v203_v51, %v139_v49  ;;  %v138_v53 = vadd.f32 0.2548296, %v136_v50 }
 0x100   :  { %v151_v54 = vsub.f32 1.0, %v149_v52  ;;  %v140_v55 = vmul.f32 %v201_v35, %v138_v53 }
 0x102   :  { %v153_v59 = vmul.f32 %v151_v54, %v113_v58  ;;  %v150_v60 = vmul.f32 %v205_v56, %v140_v55 }
 0x104   :  { %v155_v62 = vadd.f32 1.0, %v153_v59  ;;  %v152_v63 = vsub.f32 1.0, %v150_v60 }
 0x106   :  { %v157_v1 = vmul.f32 %v155_v62, %v107_v61  ;;  %v154_v2 = vmul.f32 %v152_v63, %v114_v0 }
 0x108   :  { %v180_v3 = vpack.c.bf16 %v157_v1, %v157_v1  ;;  %v156_v5 = vadd.f32 1.0, %v154_v2 }
 0x10a   :  { %168 = vst.msk [vmem:[%s257_s3] sm:$0xf] %vm167_vm5, %v180_v3  ;;  %v158_v6 = vmul.f32 %v156_v5, %v108_v4 }
 0x10c   :  { %v181_v7 = vpack.c.bf16 %v158_v6, %v158_v6 }
 0x10e   :  { %169 = vst.msk [vmem:[%s257_s3 + $0x4] sm:$0xf] %vm167_vm5, %v181_v7 }

// kernel: nanogpt_forward.11
= control target key start
LH: loop header
LB: loop body
LE: loop exit
PB: predicated region body
PF: predicated region fallthrough
CT: control target
= control target key end

     0   :  { %vm19_vm0 = vcmask 785408   ;;  %v145_v0 = vmov 0.0   ;;  %vm146_vm1 = vmmov 0   ;;  %vm43_vm2 = vcmask 261120   ;;  %s192_s1 = inlined_call_operand.vmem [shape: bf16[32,96], index: 1, kind: input, shape index: {}]   ;;  %s193_s0 = inlined_call_operand.vmem [shape: f32[16,32], index: 0, kind: input, shape index: {}]   ;;  %s194_s2 = inlined_call_operand.vmem [shape: f32[1,96], index: 2, kind: input, shape index: {}]   ;;  %s195_s3 = inlined_call_operand.vmem [shape: bf16[16,96], index: 3, kind: output, shape index: {}]  }
   0x1   :  { %133 = vmatprep.subr.bf16.mxu0 %v145_v0  ;;  %v143_v1 = vld [vmem:[%s192_s1 + $0x8] sm:$0xff]   ;;  %137 = vmatprep.mubr.msk.bf16.mxu0 %vm146_vm1, %v145_v0  ;;  %20 = vst.msk [vmem:[#allocation2] sm:$0xff] %vm19_vm0, %v145_v0  ;;  %21 = vst.msk [vmem:[#allocation2 + $0x8] sm:$0xff] %vm19_vm0, %v145_v0  ;;  %v144_v2 = vld [vmem:[%s192_s1] sm:$0xff]   ;;  %vm115_vm3 = vcmask 781312  }
   0x2   :  { %134 = vmatpush3.bf16.msra.mxu0 %v143_v1  ;;  %v24_v3 = vld [vmem:[%s193_s0] sm:$0xff]  ;;  %v25_v4 = vld [vmem:[%s193_s0 + $0x8] sm:$0xff] }
   0x3   :  { %135 = vmatprep.subr.bf16.mxu0 %v145_v0  ;;  %v26_v5 = vpack.c.bf16 %v25_v4, %v24_v3  ;;  %v125_v14 = vld [vmem:[%s194_s2] ss:$0 sm:$0xff] }
   0x6   :  { %136 = vmatpush3.bf16.msra.mxu0 %v144_v2 }
   0x8   :  { %v22_v6 = vld [vmem:[#allocation2] sm:$0xff]  ;;  %v23_v10 = vld [vmem:[#allocation2 + $0x8] sm:$0xff] }
   0x9   :  { %138 = vmatmul.mubr.msk.bf16.vlgmr.msra.gmra.mxu0 %vm43_vm2, %v26_v5 }
  0xc9   :  { %v81_v7 = vpop.f32.mrf.mxu0 }
  0xca   :  { %v88_v8 = vadd.f32 %v81_v7, %v22_v6 }
  0xcb   :  { %v139_v9 = vpop.f32.mrf.mxu0 }
  0xcc   :  { %91 = vst.msk [vmem:[#allocation2] sm:$0xff] %vm19_vm0, %v88_v8 }
  0xcd   :  { %v84_v11 = vpop.f32.mrf.mxu0 }
  0xce   :  { %v89_v12 = vadd.f32 %v84_v11, %v23_v10 }
  0xcf   :  { %v140_v13 = vpop.f32.mrf.mxu0 }
  0xd0   :  { %92 = vst.msk [vmem:[#allocation2 + $0x8] sm:$0xff] %vm19_vm0, %v89_v12 }
  0xd3   :  { %v96_v15 = vld [vmem:[#allocation2] sm:$0xff] }
  0xd4   :  { %v105_v16 = vadd.f32 %v125_v14, %v96_v15 }
  0xd6   :  { %v128_v17 = vpack.c.bf16 %v105_v16, %v105_v16 }
  0xd7   :  { %v97_v18 = vld [vmem:[#allocation2 + $0x8] sm:$0xff] }
  0xd8   :  { %116 = vst.msk [vmem:[%s195_s3] sm:$0xf] %vm115_vm3, %v128_v17  ;;  %v106_v19 = vadd.f32 %v125_v14, %v97_v18 }
  0xda   :  { %v129_v20 = vpack.c.bf16 %v106_v19, %v106_v19 }
  0xdc   :  { %117 = vst.msk [vmem:[%s195_s3 + $0x4] sm:$0xf] %vm115_vm3, %v129_v20 }

// kernel: nanogpt_forward.13
= control target key start
LH: loop header
LB: loop body
LE: loop exit
PB: predicated region body
PF: predicated region fallthrough
CT: control target
= control target key end

     0   :  { %vm28_vm0 = vcmask 261120   ;;  %v201_v0 = vmov 0.0   ;;  %vm202_vm1 = vmmov 0   ;;  %s279_s1 = inlined_call_operand.vmem [shape: bf16[32,32], index: 1, kind: input, shape index: {}]   ;;  %s280_s0 = inlined_call_operand.vmem [shape: bf16[16,32], index: 0, kind: input, shape index: {}]   ;;  %s281_s3 = inlined_call_operand.vmem [shape: f32[16,32], index: 3, kind: input, shape index: {}]   ;;  %s282_s2 = inlined_call_operand.vmem [shape: f32[1,32], index: 2, kind: input, shape index: {}]   ;;  %s283_s4 = inlined_call_operand.vmem [shape: f32[1,32], index: 4, kind: input, shape index: {}]   ;;  %s284_s5 = inlined_call_operand.vmem [shape: f32[1,32], index: 5, kind: input, shape index: {}]   ;;  %s285_s6 = inlined_call_operand.vmem [shape: f32[16,32], index: 6, kind: output, shape index: {}]  }
   0x1   :  { %184 = vmatprep.subr.bf16.mxu0 %v201_v0  ;;  %v194_v1 = vld [vmem:[%s279_s1 + $0x8] sm:$0xff]   ;;  %188 = vmatprep.mubr.msk.bf16.mxu0 %vm202_vm1, %v201_v0  ;;  %29 = vst.msk [vmem:[#allocation2] sm:$0xff] %vm28_vm0, %v201_v0  ;;  %30 = vst.msk [vmem:[#allocation2 + $0x8] sm:$0xff] %vm28_vm0, %v201_v0  ;;  %v195_v2 = vld [vmem:[%s279_s1] sm:$0xff]  }
   0x2   :  { %185 = vmatpush3.bf16.msra.mxu0 %v194_v1  ;;  %v196_v3 = vld [vmem:[%s280_s0] sm:$0xff]   ;;  %v111_v16 = vld [vmem:[%s281_s3 + $0x8] sm:$0xff] }
   0x3   :  { %186 = vmatprep.subr.bf16.mxu0 %v201_v0  ;;  %v110_v12 = vld [vmem:[%s281_s3] sm:$0xff] }
   0x4   :  { %v178_v14 = vld [vmem:[%s282_s2] ss:$0 sm:$0xff] }
   0x5   :  { %v179_v40 = vld [vmem:[%s283_s4] ss:$0 sm:$0xff] }
   0x6   :  { %187 = vmatpush3.bf16.msra.mxu0 %v195_v2  ;;  %v180_v42 = vld [vmem:[%s284_s5] ss:$0 sm:$0xff] }
   0x8   :  { %v31_v4 = vld [vmem:[#allocation2] sm:$0xff]  ;;  %v32_v8 = vld [vmem:[#allocation2 + $0x8] sm:$0xff] }
   0x9   :  { %189 = vmatmul.mubr.msk.bf16.vlgmr.msra.gmra.mxu0 %vm28_vm0, %v196_v3 }
  0xc9   :  { %v94_v5 = vpop.f32.mrf.mxu0 }
  0xca   :  { %v101_v6 = vadd.f32 %v94_v5, %v31_v4 }
  0xcb   :  { %v190_v7 = vpop.f32.mrf.mxu0 }
  0xcc   :  { %103 = vst.msk [vmem:[#allocation2] sm:$0xff] %vm28_vm0, %v101_v6 }
  0xcd   :  { %v97_v9 = vpop.f32.mrf.mxu0 }
  0xce   :  { %v102_v10 = vadd.f32 %v97_v9, %v32_v8 }
  0xcf   :  { %v191_v11 = vpop.f32.mrf.mxu0 }
  0xd0   :  { %104 = vst.msk [vmem:[#allocation2 + $0x8] sm:$0xff] %vm28_vm0, %v102_v10 }
  0xd3   :  { %v108_v13 = vld [vmem:[#allocation2] sm:$0xff] }
  0xd4   :  { %v112_v15 = vadd.f32 %v110_v12, %v108_v13 }
  0xd6   :  { %v121_v17 = vadd.f32 %v178_v14, %v112_v15 }
  0xd7   :  { %v109_v18 = vld [vmem:[#allocation2 + $0x8] sm:$0xff] }
  0xd8   :  { %v125_v19 = vsel %vm28_vm0, %v121_v17, 0.0  ;;  %v113_v20 = vadd.f32 %v111_v16, %v109_v18 }
  0xd9   :  { %126 = vadd.xlane.f32.xlu0 %v125_v19 }
  0xda   :  { %v122_v21 = vadd.f32 %v178_v14, %v113_v20 }
  0xdc   :  { %v128_v22 = vsel %vm28_vm0, %v122_v21, 0.0 }
  0xdd   :  { %129 = vadd.xlane.f32.xlu0 %v128_v22 }
 0x162   :  { %v127_v23 = vpop.xlane.xlu0 %126 }
 0x163   :  { %v132_v24 = vmul.f32 0.03125, %v127_v23 }
 0x165   :  { %v134_v25 = vsub.f32 %v121_v17, %v132_v24 }
 0x166   :  { %v130_v26 = vpop.xlane.xlu0 %129 }
 0x167   :  { %v133_v27 = vmul.f32 0.03125, %v130_v26  ;;  %v136_v28 = vmul.f32 %v134_v25, %v134_v25 }
 0x169   :  { %v135_v29 = vsub.f32 %v122_v21, %v133_v27  ;;  %v138_v30 = vsel %vm28_vm0, %v136_v28, 0.0 }
 0x16a   :  { %139 = vadd.xlane.f32.xlu1 %v138_v30 }
 0x16b   :  { %v137_v31 = vmul.f32 %v135_v29, %v135_v29 }
 0x16d   :  { %v141_v32 = vsel %vm28_vm0, %v137_v31, 0.0 }
 0x16e   :  { %142 = vadd.xlane.f32.xlu1 %v141_v32 }
 0x1f3   :  { %v140_v33 = vpop.xlane.xlu1 %139 }
 0x1f4   :  { %v144_v34 = vmul.f32 0.03125, %v140_v33 }
 0x1f6   :  { %v146_v35 = vadd.f32 1e-05, %v144_v34 }
 0x1f7   :  { %v143_v36 = vpop.xlane.xlu1 %142 }
 0x1f8   :  { %197 = vrsqrt.f32 %v146_v35  ;;  %v145_v37 = vmul.f32 0.03125, %v143_v36 }
 0x1fa   :  { %v147_v38 = vadd.f32 1e-05, %v145_v37 }
 0x1fc   :  { %199 = vrsqrt.f32 %v147_v38 }
 0x205   :  { %v198_v39 = vpop.eup %197 }
 0x206   :  { %v150_v41 = vmul.f32 %v198_v39, %v134_v25 }
 0x208   :  { %v158_v43 = vmul.f32 %v179_v40, %v150_v41 }
 0x209   :  { %v200_v44 = vpop.eup %199 }
 0x20a   :  { %v166_v45 = vadd.f32 %v180_v42, %v158_v43  ;;  %v151_v46 = vmul.f32 %v200_v44, %v135_v29 }
 0x20c   :  { %168 = vst.msk [vmem:[%s285_s6] sm:$0xff] %vm28_vm0, %v166_v45  ;;  %v159_v47 = vmul.f32 %v179_v40, %v151_v46 }
 0x20e   :  { %v167_v48 = vadd.f32 %v180_v42, %v159_v47 }
 0x210   :  { %169 = vst.msk [vmem:[%s285_s6 + $0x8] sm:$0xff] %vm28_vm0, %v167_v48 }

// kernel: nanogpt_forward.12
= control target key start
LH: loop header
LB: loop body
LE: loop exit
PB: predicated region body
PF: predicated region fallthrough
CT: control target
= control target key end

     0   :  { %s836_s6 = smov 0   ;;  %s932_s0 = inlined_call_operand.vmem [shape: bf16[16,96], index: 0, kind: input, shape index: {}]   ;;  %s933_s1 = inlined_call_operand.vmem [shape: bf16[16,32], index: 1, kind: output, shape index: {}]  }
   0x1 LB: > { %s667_s7 = sadd.s32 4294967295, %s808_s6   ;;  %p671_p0 = scmp.ge.s32.totalorder %s808_s6, 1  ;;  %s808_s6 = sphi %s836_s6, %s11_s6  }
   0x2   : > { %p86_p1 = scmp.lt.s32.totalorder %s808_s6, 3 }
   0x4   : > { %p87_p2 = pnand %p671_p0, %p86_p1 }
   0x5   : > { %p104_p3 = scmp.lt.s32.totalorder (!%p87_p2), %s667_s7, 1  ;;  %s812_s12 = smov (!%p87_p2), 96  }
   0x6   : > { %90 = sbr.rel (%p87_p2) target bundleno = 1534 (0x5fe), region = 24  ;;  %s813_s13 = smov (!%p87_p2), 64  }
   0x7   : > { %s814_s14 = smov (!%p87_p2), 88   ;;  %s815_s15 = smov (!%p87_p2), 72  }
   0x8   : > { %s816_s16 = smov (!%p87_p2), 120   ;;  %s817_s17 = smov (!%p87_p2), 80  }
   0x9   : > { %s818_s18 = smov (!%p87_p2), 112   ;;  %s819_s19 = smov (!%p87_p2), 104  }
   0xa   : > { %s820_s23 = smov (!%p87_p2), 56   ;;  %s821_s24 = smov (!%p87_p2), 48  }
   0xb   : > { %v810_v0 = vmov 0.0   ;;  %vm811_vm0 = vmmov 0   ;;  %s935_s7 = smov (!%p104_p3, %s667_s7), 1  ;;  %vm122_vm1 = vcmask 64512   ;;  %vm186_vm2 = vcmask 1043456   ;;  %s822_s25 = smov 40  }
   0xc   : > { %710 = vmatprep.subr.bf16.mxu0 %v810_v0  ;;  %712 = vmatprep.mubr.msk.bf16.mxu0 %vm811_vm0, %v810_v0  ;;  %s672_s8 = sshll.u32 %s935_s7, 2  ;;  %vm231_vm3 = vcmask 60416   ;;  %s823_s26 = smov 8   ;;  %vm358_vm4 = vcmask 126016   ;;  %vm485_vm5 = vcmask 191616   ;;  %vm612_vm6 = vcmask 257216  }
   0xd   : > { %716 = vmatprep.subr.bf16.mxu1 %v810_v0  ;;  %718 = vmatprep.mubr.msk.bf16.mxu1 %vm811_vm0, %v810_v0  ;;  %s858_s11 = scalar_lea.vmem %s932_s0, %s672_s8  ;;  %s902_s22 = scalar_lea.vmem %s933_s1, %s672_s8 }
   0xe   : > { %v113_v1 = vld [vmem:[%s858_s11] sm:$0xf]  ;;  %s824_s27 = smov 16   ;;  %s825_s28 = smov 24  }
   0xf   : > { %v674_v2 = vcombine.low %v113_v1, %v113_v1  ;;  %v114_v3 = vunpack.c.l.bf16 %v113_v1  ;;  %v233_v8 = vld [vmem:[%s858_s11] sm:$0xf] }
  0x10   : > { %v867_v9 = vcombine.low %v233_v8, %v233_v8  ;;  %v487_v15 = vld [vmem:[%s858_s11] sm:$0xf]  ;;  %v234_v24 = vunpack.c.l.bf16 %v233_v8 }
  0x11   : > { %120 = vrot.lane.b32.xlu0 %v674_v2, %s812_s12  ;;  %v115_v5 = vmul.f32 0.35355338, %v114_v3  ;;  %181 = vrot.lane.b32.xlu1 %v674_v2, %s813_s13  ;;  %v872_v16 = vcombine.low %v487_v15, %v487_v15  ;;  %v360_v26 = vld [vmem:[%s858_s11] sm:$0xf]  ;;  %v488_v31 = vunpack.c.l.bf16 %v487_v15 }
  0x12   : > { %v235_v25 = vmul.f32 0.35355338, %v234_v24  ;;  %v361_v28 = vunpack.c.l.bf16 %v360_v26  ;;  %v879_v29 = vcombine.low %v360_v26, %v360_v26 }
  0x13   : > { %v116_v7 = vpack.c.bf16 %v115_v5, %v115_v5  ;;  %v489_v33 = vmul.f32 0.35355338, %v488_v31 }
  0x14   : > { %v236_v27 = vpack.c.bf16 %v235_v25, %v235_v25  ;;  %v362_v30 = vmul.f32 0.35355338, %v361_v28 }
  0x15   : > { %243 = vrot.lane.b32.xlu1 %v867_v9, %s814_s14  ;;  %v490_v34 = vpack.c.bf16 %v489_v33, %v489_v33 }
  0x16   : > { %v363_v32 = vpack.c.bf16 %v362_v30, %v362_v30 }
  0x83   : > { %v121_v4 = vpop.permute.xlu0 %120  ;;  %v182_v17 = vpop.permute.xlu1 %181 }
  0x84   : > { %v127_v6 = vsel %vm122_vm1, %v121_v4, 0  ;;  %v188_v18 = vsel %vm186_vm2, %v182_v17, 0 }
  0x85   : > { %711 = vmatpush3.bf16.xpose.msra.mxu0 %v127_v6  ;;  %717 = vmatpush3.bf16.msra.mxu1 %v188_v18 }
  0x86   : > { %728 = vmatprep.subr.bf16.mxu0 %v810_v0  ;;  %722 = vmatprep.subr.bf16.mxu1 %v810_v0 }
  0x87   : > { %v244_v35 = vpop.permute.xlu1 %243 }
  0x88   : > { %v249_v41 = vsel %vm122_vm1, %v244_v35, 0 }
  0x8c   : > { %713 = vmatmul.mubr.msk.bf16.vlgmr.msra.gmra.mxu0 %vm122_vm1, %v116_v7 }
  0x8d   : > { %730 = vmatprep.mubr.msk.bf16.mxu0 %vm811_vm0, %v810_v0 }
 0x14c   : > { %v163_v10 = vpop.f32.mrf.mxu0 }
 0x14d   : > { %v169_v11 = vsel %vm122_vm1, %v163_v10, -inf }
 0x14e   : > { %170 = vmax.xlane.f32.xlu0 %v169_v11  ;;  %v714_v12 = vpop.f32.mrf.mxu0 }
 0x150   : > { %v166_v13 = vpop.f32.mrf.mxu0 }
 0x152   : > { %v715_v14 = vpop.f32.mrf.mxu0 }
 0x164   : > { %497 = vrot.lane.b32.xlu0 %v872_v16, %s815_s15 }
 0x1d7   : > { %v171_v19 = vpop.xlane.xlu0 %170 }
 0x1d8   : > { %v172_v20 = vsub.f32 %v163_v10, %v171_v19 }
 0x1da   : > { %v173_v21 = vmul.f32 1.442695, %v172_v20 }
 0x1db   : > { %v498_v44 = vpop.permute.xlu0 %497 }
 0x1dc   : > { %786 = vpow2.f32 %v173_v21  ;;  %v503_v46 = vsel %vm122_vm1, %v498_v44, 0 }
 0x1e9   : > { %v787_v22 = vpop.eup %786 }
 0x1ea   : > { %v175_v23 = vsel %vm122_vm1, %v787_v22, 0.0 }
 0x1eb   : > { %176 = vadd.xlane.f32.xlu1 %v175_v23 }
 0x1fc   : > { %238 = vrot.lane.b32.xlu1 %v236_v27, %s816_s16 }
 0x200   : > { %370 = vrot.lane.b32.xlu1 %v879_v29, %s817_s17 }
 0x204   : > { %365 = vrot.lane.b32.xlu1 %v363_v32, %s818_s18 }
 0x208   : > { %492 = vrot.lane.b32.xlu1 %v490_v34, %s819_s19 }
 0x274   : > { %v177_v36 = vpop.xlane.xlu1 %176 }
 0x275   : > { %788 = vrcp.f32 %v177_v36 }
 0x278   : > { %v239_v39 = vpop.permute.xlu1 %238 }
 0x27c   : > { %v371_v42 = vpop.permute.xlu1 %370 }
 0x27d   : > { %v376_v43 = vsel %vm122_vm1, %v371_v42, 0 }
 0x280   : > { %v366_v45 = vpop.permute.xlu1 %365 }
 0x282   : > { %v789_v37 = vpop.eup %788 }
 0x283   : > { %v179_v38 = vmul.f32 %v789_v37, %v787_v22 }
 0x284   : > { %v493_v47 = vpop.permute.xlu1 %492 }
 0x285   : > { %v180_v40 = vpack.c.bf16 %v179_v38, %v179_v38 }
 0x287   : > { %719 = vmatmul.mubr.msk.bf16.vlgmr.msra.gmra.mxu1 %vm122_vm1, %v180_v40 }
 0x288   : > { %723 = vmatpush3.bf16.xpose.msra.mxu1 %v249_v41  ;;  %724 = vmatprep.mubr.msk.bf16.mxu1 %vm811_vm0, %v810_v0 }
 0x289   : > { %734 = vmatprep.subr.bf16.mxu1 %v810_v0 }
 0x28f   : > { %725 = vmatmul.mubr.msk.bf16.vlgmr.msra.gmra.mxu1 %vm122_vm1, %v239_v39 }
 0x290   : > { %735 = vmatpush3.bf16.xpose.msra.mxu1 %v376_v43  ;;  %736 = vmatprep.mubr.msk.bf16.mxu1 %vm811_vm0, %v810_v0 }
 0x291   : > { %746 = vmatprep.subr.bf16.mxu1 %v810_v0 }
 0x297   : > { %737 = vmatmul.mubr.msk.bf16.vlgmr.msra.gmra.mxu1 %vm122_vm1, %v366_v45 }
 0x298   : > { %747 = vmatpush3.bf16.xpose.msra.mxu1 %v503_v46  ;;  %748 = vmatprep.mubr.msk.bf16.mxu1 %vm811_vm0, %v810_v0 }
 0x29f   : > { %749 = vmatmul.mubr.msk.bf16.vlgmr.msra.gmra.mxu1 %vm122_vm1, %v493_v47 }
 0x347   : > { %v224_v48 = vpop.f32.mrf.mxu1 }
 0x348   : > { %v230_v49 = vpack.c.bf16 %v224_v48, %v224_v48 }
 0x349   : > { %v720_v50 = vpop.f32.mrf.mxu1 }
 0x34a   : > { %232 = vst.msk [vmem:[%s902_s22] sm:$0xf] %vm231_vm3, %v230_v49 }
 0x34b   : > { %v227_v51 = vpop.f32.mrf.mxu1 }
 0x34d   : > { %v721_v52 = vpop.f32.mrf.mxu1 }
 0x34f   : > { %v285_v53 = vpop.f32.mrf.mxu1 }
 0x350   : > { %v291_v54 = vsel %vm122_vm1, %v285_v53, -inf }
 0x351   : > { %292 = vmax.xlane.f32.xlu1 %v291_v54  ;;  %v726_v55 = vpop.f32.mrf.mxu1 }
 0x353   : > { %v288_v56 = vpop.f32.mrf.mxu1 }
 0x355   : > { %v727_v57 = vpop.f32.mrf.mxu1 }
 0x357   : > { %v412_v58 = vpop.f32.mrf.mxu1 }
 0x358   : > { %v418_v59 = vsel %vm122_vm1, %v412_v58, -inf }
 0x359   : > { %419 = vmax.xlane.f32.xlu0 %v418_v59  ;;  %v738_v60 = vpop.f32.mrf.mxu1 }
 0x35b   : > { %v415_v61 = vpop.f32.mrf.mxu1 }
 0x35d   : > { %v739_v62 = vpop.f32.mrf.mxu1 }
 0x35f   : > { %v539_v63 = vpop.f32.mrf.mxu1 }
 0x360   : > { %v545_v1 = vsel %vm122_vm1, %v539_v63, -inf }
 0x361   : > { %546 = vmax.xlane.f32.xlu1 %v545_v1  ;;  %v750_v2 = vpop.f32.mrf.mxu1 }
 0x363   : > { %v542_v3 = vpop.f32.mrf.mxu1 }
 0x365   : > { %v751_v4 = vpop.f32.mrf.mxu1 }
 0x3da   : > { %v293_v5 = vpop.xlane.xlu1 %292 }
 0x3db   : > { %v294_v6 = vsub.f32 %v285_v53, %v293_v5 }
 0x3dd   : > { %v295_v7 = vmul.f32 1.442695, %v294_v6 }
 0x3df   : > { %790 = vpow2.f32 %v295_v7 }
 0x3e2   : > { %v420_v17 = vpop.xlane.xlu0 %419 }
 0x3e3   : > { %v421_v18 = vsub.f32 %v412_v58, %v420_v17 }
 0x3e5   : > { %v422_v19 = vmul.f32 1.442695, %v421_v18 }
 0x3ea   : > { %v547_v8 = vpop.xlane.xlu1 %546 }
 0x3eb   : > { %v548_v10 = vsub.f32 %v539_v63, %v547_v8 }
 0x3ec   : > { %v791_v11 = vpop.eup %790 }
 0x3ed   : > { %v549_v12 = vmul.f32 1.442695, %v548_v10  ;;  %v297_v13 = vsel %vm122_vm1, %v791_v11, 0.0 }
 0x3ee   : > { %298 = vadd.xlane.f32.xlu1 %v297_v13 }
 0x3ef   : > { %792 = vpow2.f32 %v549_v12 }
 0x3f0   : > { %794 = vpow2.f32 %v422_v19 }
 0x3fc   : > { %v793_v14 = vpop.eup %792 }
 0x3fd   : > { %v551_v15 = vsel %vm122_vm1, %v793_v14, 0.0  ;;  %v795_v20 = vpop.eup %794 }
 0x3fe   : > { %552 = vadd.xlane.f32.xlu0 %v551_v15  ;;  %v424_v21 = vsel %vm122_vm1, %v795_v20, 0.0 }
 0x3ff   : > { %303 = vrot.lane.b32.xlu1 %v867_v9, %s820_s23 }
 0x414   : > { %430 = vrot.lane.b32.xlu0 %v879_v29, %s821_s24 }
 0x423   : > { %425 = vadd.xlane.f32.xlu1 %v424_v21 }
 0x434   : > { %557 = vrot.lane.b32.xlu1 %v872_v16, %s822_s25 }
 0x477   : > { %v299_v22 = vpop.xlane.xlu1 %298 }
 0x478   : > { %796 = vrcp.f32 %v299_v22 }
 0x47b   : > { %v304_v23 = vpop.permute.xlu1 %303 }
 0x47c   : > { %v309_v24 = vsel %vm186_vm2, %v304_v23, 0 }
 0x47d   : > { %729 = vmatpush3.bf16.msra.mxu0 %v309_v24 }
 0x47e   : > { %740 = vmatprep.subr.bf16.mxu0 %v810_v0 }
 0x485   : > { %v797_v9 = vpop.eup %796 }
 0x486   : > { %v301_v25 = vmul.f32 %v797_v9, %v791_v11 }
 0x487   : > { %v553_v26 = vpop.xlane.xlu0 %552 }
 0x488   : > { %v302_v27 = vpack.c.bf16 %v301_v25, %v301_v25 }
 0x48a   : > { %731 = vmatmul.mubr.msk.bf16.vlgmr.msra.gmra.mxu0 %vm122_vm1, %v302_v27 }
 0x48b   : > { %v431_v28 = vpop.permute.xlu0 %430  ;;  %742 = vmatprep.mubr.msk.bf16.mxu0 %vm811_vm0, %v810_v0 }
 0x48c   : > { %v436_v16 = vsel %vm186_vm2, %v431_v28, 0 }
 0x48d   : > { %741 = vmatpush3.bf16.msra.mxu0 %v436_v16 }
 0x48e   : > { %752 = vmatprep.subr.bf16.mxu0 %v810_v0 }
 0x4ac   : > { %v426_v29 = vpop.xlane.xlu1 %425 }
 0x4ad   : > { %798 = vrcp.f32 %v426_v29 }
 0x4ae   : > { %800 = vrcp.f32 %v553_v26 }
 0x4b0   : > { %v558_v31 = vpop.permute.xlu1 %557 }
 0x4b1   : > { %v563_v33 = vsel %vm186_vm2, %v558_v31, 0 }
 0x4ba   : > { %v799_v30 = vpop.eup %798 }
 0x4bb   : > { %v428_v32 = vmul.f32 %v799_v30, %v795_v20  ;;  %v801_v35 = vpop.eup %800 }
 0x4bc   : > { %v555_v36 = vmul.f32 %v801_v35, %v793_v14 }
 0x4bd   : > { %v429_v34 = vpack.c.bf16 %v428_v32, %v428_v32 }
 0x4be   : > { %v556_v37 = vpack.c.bf16 %v555_v36, %v555_v36 }
 0x4bf   : > { %743 = vmatmul.mubr.msk.bf16.vlgmr.msra.gmra.mxu0 %vm122_vm1, %v429_v34 }
 0x4c0   : > { %753 = vmatpush3.bf16.msra.mxu0 %v563_v33  ;;  %754 = vmatprep.mubr.msk.bf16.mxu0 %vm811_vm0, %v810_v0 }
 0x4c7   : > { %755 = vmatmul.mubr.msk.bf16.vlgmr.msra.gmra.mxu0 %vm122_vm1, %v556_v37 }
 0x54a   : > { %v345_v38 = vpop.f32.mrf.mxu0 }
 0x54b   : > { %v691_v39 = vpack.c.bf16 %v345_v38, %v345_v38 }
 0x54c   : > { %v732_v40 = vpop.f32.mrf.mxu0 }
 0x54d   : > { %355 = vrot.lane.b32.xlu1 %v691_v39, %s823_s26 }
 0x54e   : > { %v348_v41 = vpop.f32.mrf.mxu0 }
 0x550   : > { %v733_v42 = vpop.f32.mrf.mxu0 }
 0x57f   : > { %v472_v43 = vpop.f32.mrf.mxu0 }
 0x580   : > { %v692_v44 = vpack.c.bf16 %v472_v43, %v472_v43 }
 0x581   : > { %v744_v45 = vpop.f32.mrf.mxu0 }
 0x582   : > { %482 = vrot.lane.b32.xlu0 %v692_v44, %s824_s27 }
 0x583   : > { %v475_v46 = vpop.f32.mrf.mxu0 }
 0x585   : > { %v745_v0 = vpop.f32.mrf.mxu0 }
 0x587   : > { %v599_v47 = vpop.f32.mrf.mxu0 }
 0x588   : > { %v693_v48 = vpack.c.bf16 %v599_v47, %v599_v47 }
 0x589   : > { %v756_v49 = vpop.f32.mrf.mxu0 }
 0x58a   : > { %609 = vrot.lane.b32.xlu1 %v693_v48, %s825_s28 }
 0x58b   : > { %v602_v50 = vpop.f32.mrf.mxu0 }
 0x58d   : > { %v757_v51 = vpop.f32.mrf.mxu0 }
 0x5bf   : > { %v356_v52 = vpop.permute.xlu1 %355 }
 0x5c0   : > { %359 = vst.msk [vmem:[%s902_s22] sm:$0xf] %vm358_vm4, %v356_v52 }
 0x5f4   : > { %v483_v53 = vpop.permute.xlu0 %482 }
 0x5f5   : > { %486 = vst.msk [vmem:[%s902_s22] sm:$0xf] %vm485_vm5, %v483_v53 }
 0x5fc   : > { %v610_v54 = vpop.permute.xlu1 %609 }
 0x5fd   : > { %613 = vst.msk [vmem:[%s902_s22] sm:$0xf] %vm612_vm6, %v610_v54 }
 0x5fe PF: > { %s11_s6 = sadd.s32 1, %s808_s6  }
 0x5ff   : > { %p8_p4 = scmp.ge.s32.totalorder %s11_s6, 4  }
 0x601   :  { %10 = sbr.rel (!%p8_p4) target bundleno = 1 (0x1), region = 54 }

// kernel: nanogpt_forward.21
= control target key start
LH: loop header
LB: loop body
LE: loop exit
PB: predicated region body
PF: predicated region fallthrough
CT: control target
= control target key end

     0   :  { %vm27_vm0 = vcmask 261120   ;;  %s280_s0 = inlined_call_operand.vmem [shape: f32[16,32], index: 0, kind: input, shape index: {}]   ;;  %s281_s1 = inlined_call_operand.vmem [shape: f32[1,32], index: 1, kind: input, shape index: {}]   ;;  %s282_s2 = inlined_call_operand.vmem [shape: f32[1,32], index: 2, kind: input, shape index: {}]   ;;  %s283_s3 = inlined_call_operand.vmem [shape: bf16[32,64], index: 3, kind: input, shape index: {}]   ;;  %s284_s4 = inlined_call_operand.hbm [shape: f32[16,64], index: 4, kind: output, shape index: {}]  }
   0x1   :  { %v23_v0 = vld [vmem:[%s280_s0] sm:$0xff]  ;;  %v24_v1 = vld [vmem:[%s280_s0 + $0x8] sm:$0xff] }
   0x2   :  { %v28_v2 = vsel %vm27_vm0, %v23_v0, 0.0 }
   0x3   :  { %29 = vadd.xlane.f32.xlu0 %v28_v2 }
   0x4   :  { %9 = vsyncpa [#allocation4], 0  ;;  %v31_v3 = vsel %vm27_vm0, %v24_v1, 0.0  ;;  %v195_v14 = vld [vmem:[%s283_s3 + $0x8] sm:$0xff]   ;;  %v224_v15 = vmov 0.0   ;;  %vm225_vm1 = vmmov 0  }
   0x5   :  { %182 = vmatprep.subr.bf16.mxu0 %v224_v15  ;;  %186 = vmatprep.mubr.msk.bf16.mxu0 %vm225_vm1, %v224_v15  ;;  %v196_v16 = vld [vmem:[%s283_s3] sm:$0xff]   ;;  %vm79_vm2 = vcmask 257024   ;;  %vm150_vm3 = vcmask 523264  }
   0x6   :  { %183 = vmatpush3.bf16.msra.mxu0 %v195_v14  ;;  %v169_v24 = vld [vmem:[%s281_s1] ss:$0 sm:$0xff]  ;;  %s226_s1 = smov [#allocation3]  }
   0x7   :  { %32 = vadd.xlane.f32.xlu0 %v31_v3  ;;  %184 = vmatprep.subr.bf16.mxu0 %v224_v15  ;;  %v170_v26 = vld [vmem:[%s282_s2] ss:$0 sm:$0xff]  ;;  %s158_s3 = sshll.u32 %s226_s1, 4  ;;  %s159_s3 = int_to_ptr.vmem [resolvable:$true] %s158_s3 }
   0x8   :  { %s202_s2 = scalar_lea.vmem %s159_s3, 256  ;;  %p207_p1 = scmp.lt.s32.totalorder %s159_s3, %s159_s3 }
   0x9   :  { %p203_p0 = scmp.ne.s32.totalorder %s159_s3, %s202_s2  ;;  %p208_p2 = scmp.lt.s32.totalorder %s202_s2, %s202_s2 }
   0xa   :  { %185 = vmatpush3.bf16.msra.mxu0 %v196_v16 }
   0xb   :  { %p209_p3 = por %p208_p2, %p207_p1 }
   0xd   :  { %p210_p4 = pnand %p209_p3, %p203_p0 }
  0x8c   :  { %v30_v4 = vpop.xlane.xlu0 %29 }
  0x8d   :  { %v35_v5 = vmul.f32 0.03125, %v30_v4 }
  0x8f   :  { %v37_v6 = vsub.f32 %v23_v0, %v35_v5 }
  0x90   :  { %v33_v7 = vpop.xlane.xlu0 %32 }
  0x91   :  { %v36_v8 = vmul.f32 0.03125, %v33_v7  ;;  %v39_v9 = vmul.f32 %v37_v6, %v37_v6 }
  0x93   :  { %v38_v10 = vsub.f32 %v24_v1, %v36_v8  ;;  %v41_v11 = vsel %vm27_vm0, %v39_v9, 0.0 }
  0x94   :  { %42 = vadd.xlane.f32.xlu1 %v41_v11 }
  0x95   :  { %v40_v12 = vmul.f32 %v38_v10, %v38_v10 }
  0x97   :  { %v44_v13 = vsel %vm27_vm0, %v40_v12, 0.0 }
  0x98   :  { %45 = vadd.xlane.f32.xlu1 %v44_v13 }
 0x11d   :  { %v43_v17 = vpop.xlane.xlu1 %42 }
 0x11e   :  { %v47_v18 = vmul.f32 0.03125, %v43_v17 }
 0x120   :  { %v49_v19 = vadd.f32 1e-05, %v47_v18 }
 0x121   :  { %v46_v20 = vpop.xlane.xlu1 %45 }
 0x122   :  { %198 = vrsqrt.f32 %v49_v19  ;;  %v48_v21 = vmul.f32 0.03125, %v46_v20 }
 0x124   :  { %v50_v22 = vadd.f32 1e-05, %v48_v21 }
 0x126   :  { %200 = vrsqrt.f32 %v50_v22 }
 0x12f   :  { %v199_v23 = vpop.eup %198 }
 0x130   :  { %v53_v25 = vmul.f32 %v199_v23, %v37_v6 }
 0x132   :  { %v61_v27 = vmul.f32 %v169_v24, %v53_v25 }
 0x133   :  { %v201_v28 = vpop.eup %200 }
 0x134   :  { %v69_v29 = vadd.f32 %v170_v26, %v61_v27  ;;  %v54_v30 = vmul.f32 %v201_v28, %v38_v10 }
 0x136   :  { %v177_v31 = vpack.c.bf16 %v69_v29, %v69_v29  ;;  %v62_v32 = vmul.f32 %v169_v24, %v54_v30 }
 0x138   :  { %80 = vst.msk [vmem:[#allocation2] sm:$0xf] %vm79_vm2, %v177_v31  ;;  %v70_v33 = vadd.f32 %v170_v26, %v62_v32 }
 0x13a   :  { %v178_v34 = vpack.c.bf16 %v70_v33, %v70_v33 }
 0x13c   :  { %81 = vst.msk [vmem:[#allocation2 + $0x4] sm:$0xf] %vm79_vm2, %v178_v34 }
 0x143   :  { %v197_v35 = vld [vmem:[#allocation2] sm:$0xff]  }
 0x144   :  { %187 = vmatmul.mubr.msk.bf16.vlgmr.msra.gmra.mxu0 %vm27_vm0, %v197_v35 }
 0x204   :  { %v143_v36 = vpop.f32.mrf.mxu0 }
 0x205   :  { %151 = vst.msk [vmem:[#allocation3] sm:$0xff] %vm150_vm3, %v143_v36 }
 0x206   :  { %v188_v37 = vpop.f32.mrf.mxu0 }
 0x208   :  { %v146_v38 = vpop.f32.mrf.mxu0 }
 0x209   :  { %152 = vst.msk [vmem:[#allocation3 + $0x8] sm:$0xff] %vm150_vm3, %v146_v38 }
 0x20a   :  { %v189_v39 = vpop.f32.mrf.mxu0 }
 0x20b   :  { %213 = shalt.err (!%p210_p4)
}
 0x20c   :  { %s227_s26 = smov 128   ;;  %s228_s27 = smov 8  }
 0x20d   :  { %164 = dma.vmem_to_hbm [thread:$0]  %s159_s3, 256, %s284_s4, [#allocation4], %s227_s26, %s227_s26, %s228_s27  }
 0x20e   :  { %222 = dma.done.wait [#allocation4], 256  }
 0x20f   :  { %223 = vsyncadd [#allocation4], 4294967040 }
 0x210   :  { %168 = vsyncpa [#allocation4], 1 }

// kernel: nanogpt_forward.15
= control target key start
LH: loop header
LB: loop body
LE: loop exit
PB: predicated region body
PF: predicated region fallthrough
CT: control target
= control target key end

     0   :  { %vm28_vm0 = vcmask 261120   ;;  %v228_v0 = vmov 0.0   ;;  %vm229_vm1 = vmmov 0   ;;  %vm72_vm2 = vcmask 523264   ;;  %s311_s1 = inlined_call_operand.vmem [shape: bf16[64,32], index: 1, kind: input, shape index: {}]   ;;  %s312_s0 = inlined_call_operand.vmem [shape: bf16[16,64], index: 0, kind: input, shape index: {}]   ;;  %s313_s3 = inlined_call_operand.vmem [shape: f32[16,32], index: 3, kind: input, shape index: {}]   ;;  %s314_s2 = inlined_call_operand.vmem [shape: f32[1,32], index: 2, kind: input, shape index: {}]   ;;  %s315_s4 = inlined_call_operand.vmem [shape: f32[1,32], index: 4, kind: input, shape index: {}]   ;;  %s316_s5 = inlined_call_operand.vmem [shape: f32[1,32], index: 5, kind: input, shape index: {}]   ;;  %s317_s6 = inlined_call_operand.vmem [shape: f32[16,32], index: 6, kind: output, shape index: {}]  }
   0x1   :  { %205 = vmatprep.subr.bf16.mxu0 %v228_v0  ;;  %v219_v1 = vld [vmem:[%s311_s1 + $0x18] sm:$0xff]   ;;  %213 = vmatprep.mubr.msk.bf16.mxu0 %vm229_vm1, %v228_v0  ;;  %29 = vst.msk [vmem:[#allocation2] sm:$0xff] %vm28_vm0, %v228_v0  ;;  %30 = vst.msk [vmem:[#allocation2 + $0x8] sm:$0xff] %vm28_vm0, %v228_v0  ;;  %v220_v2 = vld [vmem:[%s311_s1 + $0x10] sm:$0xff]  }
   0x2   :  { %206 = vmatpush3.bf16.msra.mxu0 %v219_v1  ;;  %v221_v3 = vld [vmem:[%s311_s1 + $0x8] sm:$0xff]   ;;  %v222_v4 = vld [vmem:[%s311_s1] sm:$0xff]  }
   0x3   :  { %207 = vmatprep.subr.bf16.mxu0 %v228_v0  ;;  %v223_v5 = vld [vmem:[%s312_s0] sm:$0xff]   ;;  %v128_v18 = vld [vmem:[%s313_s3 + $0x8] sm:$0xff] }
   0x4   :  { %v127_v14 = vld [vmem:[%s313_s3] sm:$0xff] }
   0x5   :  { %v197_v16 = vld [vmem:[%s314_s2] ss:$0 sm:$0xff] }
   0x6   :  { %208 = vmatpush3.bf16.msra.mxu0 %v220_v2  ;;  %v198_v42 = vld [vmem:[%s315_s4] ss:$0 sm:$0xff] }
   0x7   :  { %209 = vmatprep.subr.bf16.mxu0 %v228_v0  ;;  %v199_v44 = vld [vmem:[%s316_s5] ss:$0 sm:$0xff] }
   0x8   :  { %v31_v6 = vld [vmem:[#allocation2] sm:$0xff]  ;;  %v32_v10 = vld [vmem:[#allocation2 + $0x8] sm:$0xff] }
   0xa   :  { %210 = vmatpush3.bf16.msra.mxu0 %v221_v3 }
   0xb   :  { %211 = vmatprep.subr.bf16.mxu0 %v228_v0 }
   0xe   :  { %212 = vmatpush3.bf16.msra.mxu0 %v222_v4 }
  0x11   :  { %214 = vmatmul.mubr.msk.bf16.vlgmr.msra.gmra.mxu0 %vm72_vm2, %v223_v5 }
  0xd1   :  { %v110_v7 = vpop.f32.mrf.mxu0 }
  0xd2   :  { %v117_v8 = vadd.f32 %v110_v7, %v31_v6 }
  0xd3   :  { %v215_v9 = vpop.f32.mrf.mxu0 }
  0xd4   :  { %120 = vst.msk [vmem:[#allocation2] sm:$0xff] %vm28_vm0, %v117_v8 }
  0xd5   :  { %v113_v11 = vpop.f32.mrf.mxu0 }
  0xd6   :  { %v118_v12 = vadd.f32 %v113_v11, %v32_v10 }
  0xd7   :  { %v216_v13 = vpop.f32.mrf.mxu0 }
  0xd8   :  { %121 = vst.msk [vmem:[#allocation2 + $0x8] sm:$0xff] %vm28_vm0, %v118_v12 }
  0xdb   :  { %v125_v15 = vld [vmem:[#allocation2] sm:$0xff] }
  0xdc   :  { %v129_v17 = vadd.f32 %v127_v14, %v125_v15 }
  0xde   :  { %v138_v19 = vadd.f32 %v197_v16, %v129_v17 }
  0xdf   :  { %v126_v20 = vld [vmem:[#allocation2 + $0x8] sm:$0xff] }
  0xe0   :  { %v142_v21 = vsel %vm28_vm0, %v138_v19, 0.0  ;;  %v130_v22 = vadd.f32 %v128_v18, %v126_v20 }
  0xe1   :  { %143 = vadd.xlane.f32.xlu0 %v142_v21 }
  0xe2   :  { %v139_v23 = vadd.f32 %v197_v16, %v130_v22 }
  0xe4   :  { %v145_v24 = vsel %vm28_vm0, %v139_v23, 0.0 }
  0xe5   :  { %146 = vadd.xlane.f32.xlu0 %v145_v24 }
 0x16a   :  { %v144_v25 = vpop.xlane.xlu0 %143 }
 0x16b   :  { %v149_v26 = vmul.f32 0.03125, %v144_v25 }
 0x16d   :  { %v151_v27 = vsub.f32 %v138_v19, %v149_v26 }
 0x16e   :  { %v147_v28 = vpop.xlane.xlu0 %146 }
 0x16f   :  { %v150_v29 = vmul.f32 0.03125, %v147_v28  ;;  %v153_v30 = vmul.f32 %v151_v27, %v151_v27 }
 0x171   :  { %v152_v31 = vsub.f32 %v139_v23, %v150_v29  ;;  %v155_v32 = vsel %vm28_vm0, %v153_v30, 0.0 }
 0x172   :  { %156 = vadd.xlane.f32.xlu1 %v155_v32 }
 0x173   :  { %v154_v33 = vmul.f32 %v152_v31, %v152_v31 }
 0x175   :  { %v158_v34 = vsel %vm28_vm0, %v154_v33, 0.0 }
 0x176   :  { %159 = vadd.xlane.f32.xlu1 %v158_v34 }
 0x1fb   :  { %v157_v35 = vpop.xlane.xlu1 %156 }
 0x1fc   :  { %v161_v36 = vmul.f32 0.03125, %v157_v35 }
 0x1fe   :  { %v163_v37 = vadd.f32 1e-05, %v161_v36 }
 0x1ff   :  { %v160_v38 = vpop.xlane.xlu1 %159 }
 0x200   :  { %224 = vrsqrt.f32 %v163_v37  ;;  %v162_v39 = vmul.f32 0.03125, %v160_v38 }
 0x202   :  { %v164_v40 = vadd.f32 1e-05, %v162_v39 }
 0x204   :  { %226 = vrsqrt.f32 %v164_v40 }
 0x20d   :  { %v225_v41 = vpop.eup %224 }
 0x20e   :  { %v167_v43 = vmul.f32 %v225_v41, %v151_v27 }
 0x210   :  { %v175_v45 = vmul.f32 %v198_v42, %v167_v43 }
 0x211   :  { %v227_v46 = vpop.eup %226 }
 0x212   :  { %v183_v47 = vadd.f32 %v199_v44, %v175_v45  ;;  %v168_v48 = vmul.f32 %v227_v46, %v152_v31 }
 0x214   :  { %185 = vst.msk [vmem:[%s317_s6] sm:$0xff] %vm28_vm0, %v183_v47  ;;  %v176_v49 = vmul.f32 %v198_v42, %v168_v48 }
 0x216   :  { %v184_v50 = vadd.f32 %v199_v44, %v176_v49 }
 0x218   :  { %186 = vst.msk [vmem:[%s317_s6 + $0x8] sm:$0xff] %vm28_vm0, %v184_v50 }

</bundles_post_ra>
